<compile_context>
chip_gen: v6e
topology: v6e:2x2x1
jax: 0.10.0
libtpu: 0.0.40
codegen_flags: <defaults>
</compile_context>

<pallas_src>
import functools

import numpy as np

import jax
import jax.numpy as jnp
from jax.experimental import pallas as pl
from jax.experimental.pallas import tpu as pltpu

EPS_BN = 1e-5


# ----------------------------------------------------------------------------
# Chip-aware sizing helpers
# ----------------------------------------------------------------------------
def _chip_info():
    kind = ""
    try:
        kind = jax.devices()[0].device_kind.lower()
    except Exception:
        pass
    try:
        vmem_cap = int(pltpu.get_tpu_info().vmem_capacity_bytes)
    except Exception:
        vmem_cap = 64 * 1024 * 1024              # conservative: v7x per-TC VMEM
    bf16_valu = any(t in kind for t in ("v6", "v7", "7x"))          # v6e / v7x
    multi_core = any(t in kind for t in ("v7", "7x", "v4", "v5p"))  # >1 TC shares grid
    return {"kind": kind, "vmem_cap": vmem_cap,
            "bf16_valu": bf16_valu, "multi_core": multi_core}


def _compiler_params(block_bytes, vmem_cap):
    """vmem_limit sized from the actual per-step footprint (double-buffered),
    capped below physical VMEM (64 MiB/TC on v7x, 128 MiB on v5e/v6e)."""
    limit = max(32 << 20, int(block_bytes) + (8 << 20))
    limit = min(limit, int(vmem_cap) - (8 << 20))
    limit = max(limit, 16 << 20)
    return pltpu.CompilerParams(dimension_semantics=("parallel",),
                                vmem_limit_bytes=limit)


def _max_images_per_block(h, w, cin, cout, kh, d1_bytes, vmem_cap):
    """Largest image count per grid step that keeps the stage-2 working set
    (x + d1 + out blocks, double-buffered, plus both band weights) inside
    ~70% of physical VMEM."""
    per_img = 2 * h * w * (cin * 4 + cout * (d1_bytes + 4))
    bands = 2 * 2 * kh * w * cout * (w * cin + w * cout)     # bf16, 2 buffers each
    budget = int(vmem_cap * 0.7) - bands - (4 << 20)
    if budget <= per_img:
        # TODO(synk): W-tile the block-Toeplitz band (or fall back to per-kh
        # shifted dots) when W*Cin / W*Cout grows past the VMEM budget; the
        # band weight scales as W^2 and cannot fit v7x's 64 MiB VMEM at large W.
        return 1
    return max(1, budget // per_img)


def pick_block_images(n, h, *, max_imgs, multi_core, target_rows=512):
    """Images per grid step: fill the MXU M dim (nb*H rows, target ~256-512)
    on single-core chips; on multi-core chips keep >= 2 parallel grid steps
    only when that does not shrink M below ~128 rows (or the whole problem is
    tiny anyway)."""
    cap = max(1, min(n, int(max_imgs)))
    divs = [d for d in range(1, cap + 1) if n % d == 0]
    fit = [d for d in divs if d * h <= target_rows] or divs[:1]
    nb = max(fit)
    if multi_core and n // nb < 2:
        alt = [d for d in fit if n // d >= 2 and (d * h >= 128 or nb * h < 128)]
        if alt:
            nb = max(alt)
    # TODO(synk): tile along H with a 1-row halo so M per dot reaches >=128
    # even for small / prime N (today nb must divide N).
    return nb


# ----------------------------------------------------------------------------
# In-kernel helpers / kernels
# ----------------------------------------------------------------------------
def _make_tap_masks(nb, img_rows, wcout, kh_taps):
    """Per-kh-tap boolean row masks, computed ONCE per kernel invocation and
    shared by every conv in the kernel body."""
    m = nb * img_rows
    row = jax.lax.broadcasted_iota(jnp.int32, (m, wcout), 0) % img_rows
    ph = kh_taps // 2
    masks = []
    for kh in range(kh_taps):
        d = kh - ph
        if d == 0:
            masks.append(None)
        elif d < 0:
            masks.append(row >= -d)
        else:
            masks.append(row < img_rows - d)
    return masks


def _conv_rows(xn, band_cat, bias, masks, *, kh_taps):
    """3x3 'SAME' conv on row-flattened images via a single MXU dot.

    xn       : (M, W*Cin) in the elementwise dtype, M = Nb*img_rows.
    band_cat : (W*Cin, kh_taps*W*Cout) block-Toeplitz weights (bf16); kw is
               folded into the Toeplitz structure, kh taps concatenated along
               lanes.
    bias     : (1, W*Cout) f32.
    masks    : per-kh-tap row masks from _make_tap_masks (hoisted).

    out[r] = bias + sum_kh P_kh[r + kh - ph]; rows outside an image are zero.
    The vertical shift is applied to the products with an XLU roll + mask.
    """
    m = xn.shape[0]
    wcout = band_cat.shape[1] // kh_taps
    ph = kh_taps // 2

    # astype is a no-op when xn is already bf16 (v6e/v7x elementwise path).
    p = jnp.dot(xn.astype(band_cat.dtype), band_cat,
                preferred_element_type=jnp.float32)            # (M, kh*W*Cout)

    out = jnp.broadcast_to(bias, (m, wcout))
    for kh in range(kh_taps):
        pk = p[:, kh * wcout:(kh + 1) * wcout]
        d = kh - ph                                            # source row offset
        if d == 0:
            out = out + pk
        else:
            shifted = pltpu.roll(pk, shift=(-d) % m, axis=0)   # shifted[r]=pk[r+d]
            out = out + jnp.where(masks[kh], shifted, 0.0)
    return out


def stage1_kernel(x_ref, sc_ref, sh_ref, band_ref, bias_ref,
                  d1_ref, dsum_ref, dsq_ref, *, img_rows, kh_taps, ew_dtype):
    """Stage 1: d1 = conv_d1(relu(bn_d1(x))) + bias_d1   (bf16 out)
       plus per-block channel sum / sum-of-squares of d1 (f32, pre-cast)."""
    nb, _, wcin = x_ref.shape
    wcout = d1_ref.shape[2]
    m = nb * img_rows

    x = x_ref[...].reshape(m, wcin).astype(ew_dtype)
    xd = jnp.maximum(x * sc_ref[...] + sh_ref[...], 0.0)       # BN + ReLU

    masks = _make_tap_masks(nb, img_rows, wcout, kh_taps)
    d1 = _conv_rows(xd, band_ref[...], bias_ref[...], masks, kh_taps=kh_taps)  # f32

    d1_ref[...] = d1.reshape(nb, img_rows, wcout).astype(d1_ref.dtype)
    dsum_ref[...] = jnp.sum(d1, axis=0, keepdims=True).reshape(1, 1, wcout)
    dsq_ref[...] = jnp.sum(d1 * d1, axis=0, keepdims=True).reshape(1, 1, wcout)


def stage2_kernel(x_ref, d1_ref, sc_s_ref, sh_s_ref, sc_d_ref, sh_d_ref,
                  band_s_ref, band_d_ref, bias_s_ref, bias_d_ref,
                  out_ref, *, img_rows, kh_taps, ew_dtype):
    """Stage 2 (fused): out = conv_s(bn_s(x)) + bias_s
                              + conv_d2(relu(bn_d2(d1))) + bias_d2
       The single-branch conv is recomputed here from the x block instead of
       being round-tripped through HBM in f32."""
    nb, _, wcin = x_ref.shape
    wcmid = d1_ref.shape[2]
    wcout = out_ref.shape[2]
    m = nb * img_rows

    masks = _make_tap_masks(nb, img_rows, wcout, kh_taps)      # shared by both convs

    # single branch: conv_s(bn_s(x)) + bias_s  (no ReLU)
    x = x_ref[...].reshape(m, wcin).astype(ew_dtype)
    xs = x * sc_s_ref[...] + sh_s_ref[...]
    single = _conv_rows(xs, band_s_ref[...], bias_s_ref[...], masks, kh_taps=kh_taps)

    # double branch stage 2: conv_d2(relu(bn_d2(d1))) + bias_d2
    d = d1_ref[...].reshape(m, wcmid).astype(ew_dtype)
    xd = jnp.maximum(d * sc_d_ref[...] + sh_d_ref[...], 0.0)
    y = _conv_rows(xd, band_d_ref[...], bias_d_ref[...], masks, kh_taps=kh_taps)

    out_ref[...] = (single + y).reshape(nb, img_rows, wcout).astype(out_ref.dtype)


# ----------------------------------------------------------------------------
# pallas_call wrappers
# ----------------------------------------------------------------------------
def stage1(x_flat, sc_d, sh_d, band_d, bias_d, *, nb, kh, d1_dtype, ew_dtype,
           vmem_cap):
    n, h, wcin = x_flat.shape
    wcout = bias_d.shape[1]
    nblk = n // nb
    kernel = functools.partial(stage1_kernel, img_rows=h, kh_taps=kh,
                               ew_dtype=ew_dtype)
    d1_b = np.dtype(d1_dtype).itemsize
    flops = 2 * n * h * wcin * kh * wcout
    bytes_accessed = int(x_flat.size * 4 + n * h * wcout * d1_b
                         + band_d.size * band_d.dtype.itemsize
                         + 2 * nblk * wcout * 4)
    block_bytes = (2 * nb * h * (wcin * 4 + wcout * d1_b)
                   + 2 * band_d.size * band_d.dtype.itemsize
                   + 8 * wcout * 4)
    return pl.pallas_call(
        kernel,
        out_shape=(jax.ShapeDtypeStruct((n, h, wcout), d1_dtype),        # d1
                   jax.ShapeDtypeStruct((nblk, 1, wcout), jnp.float32),  # sum(d1)
                   jax.ShapeDtypeStruct((nblk, 1, wcout), jnp.float32)), # sum(d1^2)
        grid_spec=pltpu.PrefetchScalarGridSpec(
            num_scalar_prefetch=0, grid=(nblk,),
            in_specs=[
                pl.BlockSpec((nb, h, wcin), lambda i: (i, 0, 0)),
                pl.BlockSpec((1, wcin), lambda i: (0, 0)),
                pl.BlockSpec((1, wcin), lambda i: (0, 0)),
                pl.BlockSpec((wcin, kh * wcout), lambda i: (0, 0)),
                pl.BlockSpec((1, wcout), lambda i: (0, 0)),
            ],
            out_specs=(
                pl.BlockSpec((nb, h, wcout), lambda i: (i, 0, 0)),
                pl.BlockSpec((1, 1, wcout), lambda i: (i, 0, 0)),
                pl.BlockSpec((1, 1, wcout), lambda i: (i, 0, 0)),
            )),
        compiler_params=_compiler_params(block_bytes, vmem_cap),
        cost_estimate=pl.CostEstimate(flops=flops, transcendentals=0,
                                      bytes_accessed=bytes_accessed),
    )(x_flat, sc_d, sh_d, band_d, bias_d)


def stage2(x_flat, d1, sc_s, sh_s, sc_d, sh_d, band_s, band_d, bias_s, bias_d,
           *, nb, kh, ew_dtype, vmem_cap):
    n, h, wcin = x_flat.shape
    wcmid = d1.shape[2]                      # W * Cout (input lanes of conv_d2)
    wcout = bias_d.shape[1]
    nblk = n // nb
    kernel = functools.partial(stage2_kernel, img_rows=h, kh_taps=kh,
                               ew_dtype=ew_dtype)
    d1_b = d1.dtype.itemsize
    flops = 2 * n * h * (wcin + wcmid) * kh * wcout
    bytes_accessed = int(x_flat.size * 4 + d1.size * d1_b + n * h * wcout * 4
                         + (band_s.size + band_d.size) * band_s.dtype.itemsize)
    block_bytes = (2 * nb * h * (wcin * 4 + wcmid * d1_b + wcout * 4)
                   + 2 * (band_s.size + band_d.size) * band_s.dtype.itemsize)
    return pl.pallas_call(
        kernel,
        out_shape=jax.ShapeDtypeStruct((n, h, wcout), jnp.float32),
        grid_spec=pltpu.PrefetchScalarGridSpec(
            num_scalar_prefetch=0, grid=(nblk,),
            in_specs=[
                pl.BlockSpec((nb, h, wcin), lambda i: (i, 0, 0)),
                pl.BlockSpec((nb, h, wcmid), lambda i: (i, 0, 0)),
                pl.BlockSpec((1, wcin), lambda i: (0, 0)),
                pl.BlockSpec((1, wcin), lambda i: (0, 0)),
                pl.BlockSpec((1, wcmid), lambda i: (0, 0)),
                pl.BlockSpec((1, wcmid), lambda i: (0, 0)),
                pl.BlockSpec((wcin, kh * wcout), lambda i: (0, 0)),
                pl.BlockSpec((wcmid, kh * wcout), lambda i: (0, 0)),
                pl.BlockSpec((1, wcout), lambda i: (0, 0)),
                pl.BlockSpec((1, wcout), lambda i: (0, 0)),
            ],
            out_specs=pl.BlockSpec((nb, h, wcout), lambda i: (i, 0, 0))),
        compiler_params=_compiler_params(block_bytes, vmem_cap),
        cost_estimate=pl.CostEstimate(flops=flops, transcendentals=0,
                                      bytes_accessed=bytes_accessed),
    )(x_flat, d1, sc_s, sh_s, sc_d, sh_d, band_s, band_d, bias_s, bias_d)


# ----------------------------------------------------------------------------
# Glue: spectral norm, weight layout, BatchNorm affine (parameter preparation)
# ----------------------------------------------------------------------------
def spectral_normalize(w_oihw, u0, eps=1e-12):
    """One power iteration (PyTorch spectral_norm training-mode forward)."""
    cout = w_oihw.shape[0]
    wmat = w_oihw.reshape(cout, -1)
    u = u0 / (jnp.linalg.norm(u0) + eps)
    v = wmat.T @ u
    v = v / (jnp.linalg.norm(v) + eps)
    u = wmat @ v
    u = u / (jnp.linalg.norm(u) + eps)
    sigma = jnp.dot(u, wmat @ v)
    return w_oihw / sigma


def to_hwio(w_oihw):
    return jnp.transpose(w_oihw, (2, 3, 1, 0))  # (KH, KW, Cin, Cout)


def build_band_cat(w_hwio, W):
    """Lane-concatenated block-Toeplitz weights, shape (W*Cin, KH*W*Cout).

    band[kh][(s*Cin + ci), (w*Cout + co)] = w[kh, kw, ci, co] with s = w+kw-pw.
    Out-of-image source columns are dropped (they would multiply zero padding),
    so the activations need no horizontal padding and every in-kernel access
    stays lane-aligned at offset 0."""
    KH, KW, Cin, Cout = w_hwio.shape
    pw = KW // 2
    B = jnp.zeros((KH, W, W, Cin, Cout), w_hwio.dtype)   # (kh, src_w, dst_w, ci, co)
    dst = np.arange(W)
    for kw in range(KW):
        src = dst + kw - pw
        sel = (src >= 0) & (src < W)
        B = B.at[:, src[sel], dst[sel]].set(w_hwio[:, kw][:, None])
    band = B.transpose(0, 1, 3, 2, 4).reshape(KH, W * Cin, W * Cout)
    return band.transpose(1, 0, 2).reshape(W * Cin, KH * W * Cout)


def moments_from_partials(psum, psq, W, C, count):
    # TODO(synk): E[x^2]-E[x]^2 can cancel for large-mean activations; use a
    # shifted / two-pass variance if that regime ever matters.
    s = psum.reshape(-1, W, C).sum(axis=(0, 1))
    q = psq.reshape(-1, W, C).sum(axis=(0, 1))
    mean = s / count
    var = q / count - mean * mean          # biased var (BN training semantics)
    return mean, var


def bn_affine_flat(mean, var, gamma, beta, W, eps=EPS_BN):
    scale = gamma / jnp.sqrt(var + eps)
    shift = beta - mean * scale
    return jnp.tile(scale, W)[None, :], jnp.tile(shift, W)[None, :]


# ----------------------------------------------------------------------------
# DoubleConv2d forward (Pallas)
# ----------------------------------------------------------------------------
def double_conv2d_forward(x_nchw, p, compute_dtype=jnp.bfloat16):
    N, Cin, H, W = x_nchw.shape

    chip = _chip_info()
    ew_dtype = jnp.bfloat16 if chip["bf16_valu"] else jnp.float32

    # Input BatchNorm moments via plain XLA reduction on x_nchw (fuses with the
    # transpose read of x; no extra pallas_call / HBM pass just for stats).
    mean_x = jnp.mean(x_nchw, axis=(0, 2, 3))
    var_x = jnp.var(x_nchw, axis=(0, 2, 3))     # biased (BN training semantics)

    # NHWC with W and C flattened into the lane dim.
    # TODO(synk): keep NHWC end-to-end for consumers that accept it; each
    # NCHW<->NHWC transpose is an extra full HBM pass over the tensor.
    x = jnp.transpose(x_nchw, (0, 2, 3, 1)).reshape(N, H, W * Cin)

    w_s = to_hwio(spectral_normalize(p['w_s'], p['u_s']))
    w_d1 = to_hwio(spectral_normalize(p['w_d1'], p['u_d1']))
    w_d2 = to_hwio(spectral_normalize(p['w_d2'], p['u_d2']))
    KH, _, _, Cout = w_s.shape

    band_s = build_band_cat(w_s, W).astype(compute_dtype)
    band_d1 = build_band_cat(w_d1, W).astype(compute_dtype)
    band_d2 = build_band_cat(w_d2, W).astype(compute_dtype)
    bias_s = jnp.tile(p['bias_s'], W)[None, :]
    bias_d1 = jnp.tile(p['bias_d1'], W)[None, :]
    bias_d2 = jnp.tile(p['bias_d2'], W)[None, :]

    d1_bytes = np.dtype(compute_dtype).itemsize
    max_imgs = _max_images_per_block(H, W, Cin, Cout, KH, d1_bytes,
                                     chip["vmem_cap"])
    nb = pick_block_images(N, H, max_imgs=max_imgs,
                           multi_core=chip["multi_core"])

    sc_s, sh_s = bn_affine_flat(mean_x, var_x, p['g_s'], p['b_s'], W)
    sc_d1, sh_d1 = bn_affine_flat(mean_x, var_x, p['g_d1'], p['b_d1'], W)

    # Stage 1: d1 (bf16) + its sum / sum-of-squares partials (reads x once).
    d1, dsum, dsq = stage1(
        x, sc_d1.astype(ew_dtype), sh_d1.astype(ew_dtype), band_d1, bias_d1,
        nb=nb, kh=KH, d1_dtype=compute_dtype, ew_dtype=ew_dtype,
        vmem_cap=chip["vmem_cap"])

    mean_d, var_d = moments_from_partials(dsum, dsq, W, Cout, N * H * W)
    sc_d2, sh_d2 = bn_affine_flat(mean_d, var_d, p['g_d2'], p['b_d2'], W)

    # Stage 2 (fused): single-branch conv recomputed from x + second double
    # conv + residual add; only the final f32 output hits HBM.
    out = stage2(
        x, d1, sc_s.astype(ew_dtype), sh_s.astype(ew_dtype),
        sc_d2.astype(ew_dtype), sh_d2.astype(ew_dtype),
        band_s, band_d2, bias_s, bias_d2,
        nb=nb, kh=KH, ew_dtype=ew_dtype, vmem_cap=chip["vmem_cap"])

    return jnp.transpose(out.reshape(N, H, W, Cout), (0, 3, 1, 2))   # NCHW


# ----------------------------------------------------------------------------
# Pure-JAX reference (f32, for sanity checking)
# ----------------------------------------------------------------------------
def reference_forward(x_nchw, p):
    x = jnp.transpose(x_nchw, (0, 2, 3, 1))

    def bn(v, gamma, beta):
        mean = v.mean(axis=(0, 1, 2))
        var = v.var(axis=(0, 1, 2))
        return (v - mean) / jnp.sqrt(var + EPS_BN) * gamma + beta

    def conv(v, w_hwio, b):
        y = jax.lax.conv_general_dilated(
            v, w_hwio, (1, 1), 'SAME',
            dimension_numbers=('NHWC', 'HWIO', 'NHWC'))
        return y + b

    w_s = to_hwio(spectral_normalize(p['w_s'], p['u_s']))
    w_d1 = to_hwio(spectral_normalize(p['w_d1'], p['u_d1']))
    w_d2 = to_hwio(spectral_normalize(p['w_d2'], p['u_d2']))

    single = conv(bn(x, p['g_s'], p['b_s']), w_s, p['bias_s'])
    d = conv(jnp.maximum(bn(x, p['g_d1'], p['b_d1']), 0.0), w_d1, p['bias_d1'])
    d = conv(jnp.maximum(bn(d, p['g_d2'], p['b_d2']), 0.0), w_d2, p['bias_d2'])
    return jnp.transpose(single + d, (0, 3, 1, 2))


# ----------------------------------------------------------------------------
if __name__ == "__main__":
    N, Cin, Cout, H, W, K = 2, 4, 8, 16, 16, 3

    keys = iter(jax.random.split(jax.random.PRNGKey(0), 16))

    def rnorm(shape, scale=1.0, offset=0.0):
        return scale * jax.random.normal(next(keys), shape, jnp.float32) + offset

    x = rnorm((N, Cin, H, W))

    params = {
        # BN params: single branch / double branch stage 1 (Cin), stage 2 (Cout)
        'g_s': rnorm((Cin,), 0.3, 1.0), 'b_s': rnorm((Cin,), 0.1),
        'g_d1': rnorm((Cin,), 0.3, 1.0), 'b_d1': rnorm((Cin,), 0.1),
        'g_d2': rnorm((Cout,), 0.3, 1.0), 'b_d2': rnorm((Cout,), 0.1),
        # conv weights (PyTorch OIHW) + biases + spectral-norm u vectors
        'w_s': rnorm((Cout, Cin, K, K), 0.3), 'bias_s': rnorm((Cout,), 0.1),
        'u_s': rnorm((Cout,)),
        'w_d1': rnorm((Cout, Cin, K, K), 0.3), 'bias_d1': rnorm((Cout,), 0.1),
        'u_d1': rnorm((Cout,)),
        'w_d2': rnorm((Cout, Cout, K, K), 0.3), 'bias_d2': rnorm((Cout,), 0.1),
        'u_d2': rnorm((Cout,)),
    }

    out = jax.jit(double_conv2d_forward)(x, params)
    out = jax.block_until_ready(out)

    ref = jax.block_until_ready(reference_forward(x, params))
    assert out.shape == (N, Cout, H, W), out.shape
    max_err = float(jnp.max(jnp.abs(out - ref)))
    # bf16 MXU operands + bf16 d1 intermediate (+ bf16 elementwise BN on
    # v6e/v7x), with a BatchNorm 1/std gain between the two chained convs
    # -> a few x 1e-2 vs. the f32 reference.
    assert jnp.allclose(out, ref, atol=5e-2, rtol=5e-2), max_err
    print("KERNEL_OK")
</pallas_src>

<mosaic_0001>
module attributes {stable_mosaic.version = 11 : i64} {
  func.func @stage1_kernel(%arg0: i32, %arg1: memref<2x16x64xf32, #tpu.memory_space<vmem>>, %arg2: memref<1x64xf32, #tpu.memory_space<vmem>>, %arg3: memref<1x64xf32, #tpu.memory_space<vmem>>, %arg4: memref<64x384xbf16, #tpu.memory_space<vmem>>, %arg5: memref<1x128xf32, #tpu.memory_space<vmem>>, %arg6: memref<2x16x128xbf16, #tpu.memory_space<vmem>>, %arg7: memref<1x1x128xf32, #tpu.memory_space<vmem>>, %arg8: memref<1x1x128xf32, #tpu.memory_space<vmem>>) attributes {dimension_semantics = [#tpu.dimension_semantics<parallel>], iteration_bounds = array<i64: 1>, scalar_prefetch = 0 : i64, scratch_operands = 0 : i64, tpu.core_type = #tpu.core_type<tc>, window_params = [{transform_indices = @transform_0, window_bounds = array<i64: 2, 16, 64>}, {pipeline_mode = #tpu.pipeline_mode<synchronous>, transform_indices = @transform_1, window_bounds = array<i64: 1, 64>}, {pipeline_mode = #tpu.pipeline_mode<synchronous>, transform_indices = @transform_2, window_bounds = array<i64: 1, 64>}, {pipeline_mode = #tpu.pipeline_mode<synchronous>, transform_indices = @transform_3, window_bounds = array<i64: 64, 384>}, {pipeline_mode = #tpu.pipeline_mode<synchronous>, transform_indices = @transform_4, window_bounds = array<i64: 1, 128>}, {transform_indices = @transform_5, window_bounds = array<i64: 2, 16, 128>}, {transform_indices = @transform_6, window_bounds = array<i64: 1, 1, 128>}, {transform_indices = @transform_7, window_bounds = array<i64: 1, 1, 128>}]} {
    %c0 = arith.constant 0 : index
    %c0_0 = arith.constant 0 : index
    %c0_1 = arith.constant 0 : index
    %0 = vector.load %arg1[%c0, %c0_0, %c0_1] : memref<2x16x64xf32, #tpu.memory_space<vmem>>, vector<2x16x64xf32>
    %1 = vector.shape_cast %0 : vector<2x16x64xf32> to vector<32x64xf32>
    %c0_2 = arith.constant 0 : index
    %c0_3 = arith.constant 0 : index
    %2 = vector.load %arg2[%c0_2, %c0_3] : memref<1x64xf32, #tpu.memory_space<vmem>>, vector<1x64xf32>
    %3 = vector.broadcast %2 : vector<1x64xf32> to vector<32x64xf32>
    %4 = arith.mulf %1, %3 : vector<32x64xf32>
    %c0_4 = arith.constant 0 : index
    %c0_5 = arith.constant 0 : index
    %5 = vector.load %arg3[%c0_4, %c0_5] : memref<1x64xf32, #tpu.memory_space<vmem>>, vector<1x64xf32>
    %6 = vector.broadcast %5 : vector<1x64xf32> to vector<32x64xf32>
    %7 = arith.addf %4, %6 : vector<32x64xf32>
    %cst = arith.constant 0.000000e+00 : f32
    %8 = vector.broadcast %cst : f32 to vector<32x64xf32>
    %9 = arith.maximumf %7, %8 : vector<32x64xf32>
    %10 = tpu.iota {dimensions = array<i32: 0>} : vector<32x128xi32>
    %c16_i32 = arith.constant 16 : i32
    %c0_i32 = arith.constant 0 : i32
    %11 = arith.cmpi eq, %c16_i32, %c0_i32 : i32
    %c1_i32 = arith.constant 1 : i32
    %12 = arith.select %11, %c1_i32, %c16_i32 : i32
    %13 = vector.broadcast %12 : i32 to vector<32x128xi32>
    %14 = arith.remsi %10, %13 : vector<32x128xi32>
    %c0_i32_6 = arith.constant 0 : i32
    %15 = vector.broadcast %c0_i32_6 : i32 to vector<32x128xi32>
    %16 = arith.cmpi ne, %14, %15 : vector<32x128xi32>
    %c0_i32_7 = arith.constant 0 : i32
    %17 = vector.broadcast %c0_i32_7 : i32 to vector<32x128xi32>
    %18 = arith.cmpi slt, %14, %17 : vector<32x128xi32>
    %c0_i32_8 = arith.constant 0 : i32
    %19 = arith.cmpi slt, %12, %c0_i32_8 : i32
    %20 = vector.broadcast %19 : i1 to vector<32x128xi1>
    %21 = vector.broadcast %20 : vector<32x128xi1> to vector<32x128xi1>
    %22 = arith.xori %18, %21 : vector<32x128xi1>
    %23 = arith.andi %22, %16 : vector<32x128xi1>
    %24 = vector.broadcast %12 : i32 to vector<32x128xi32>
    %25 = arith.addi %14, %24 : vector<32x128xi32>
    %26 = arith.select %23, %25, %14 : vector<32x128xi1>, vector<32x128xi32>
    %c1_i32_9 = arith.constant 1 : i32
    %27 = vector.broadcast %c1_i32_9 : i32 to vector<32x128xi32>
    %28 = arith.cmpi sge, %26, %27 : vector<32x128xi32>
    %c15_i32 = arith.constant 15 : i32
    %29 = vector.broadcast %c15_i32 : i32 to vector<32x128xi32>
    %30 = arith.cmpi slt, %26, %29 : vector<32x128xi32>
    %c0_10 = arith.constant 0 : index
    %c0_11 = arith.constant 0 : index
    %31 = vector.load %arg4[%c0_10, %c0_11] : memref<64x384xbf16, #tpu.memory_space<vmem>>, vector<64x384xbf16>
    %c0_12 = arith.constant 0 : index
    %c0_13 = arith.constant 0 : index
    %32 = vector.load %arg5[%c0_12, %c0_13] : memref<1x128xf32, #tpu.memory_space<vmem>>, vector<1x128xf32>
    %33 = arith.truncf %9 : vector<32x64xf32> to vector<32x64xbf16>
    %cst_14 = arith.constant dense<0.000000e+00> : vector<32x384xf32>
    %34 = tpu.matmul %33, %31, %cst_14 {dimension_numbers = #tpu.dot_dimension_numbers<[1], [0], [0], [1], [0, 0, 1, 1], [], []>} : vector<32x64xbf16>, vector<64x384xbf16>, vector<32x384xf32> -> vector<32x384xf32>
    %35 = vector.shape_cast %32 : vector<1x128xf32> to vector<1x128xf32>
    %36 = vector.broadcast %35 : vector<1x128xf32> to vector<32x128xf32>
    %37 = vector.extract_strided_slice %34 {offsets = [0, 0], sizes = [32, 128], strides = [1, 1]} : vector<32x384xf32> to vector<32x128xf32>
    %c1_i32_15 = arith.constant 1 : i32
    %38 = tpu.dynamic_rotate %37 by %c1_i32_15 dim 0 : vector<32x128xf32>, i32 -> vector<32x128xf32>
    %cst_16 = arith.constant 0.000000e+00 : f32
    %39 = vector.broadcast %cst_16 : f32 to vector<32x128xf32>
    %40 = arith.select %28, %38, %39 : vector<32x128xi1>, vector<32x128xf32>
    %41 = arith.addf %36, %40 : vector<32x128xf32>
    %42 = vector.extract_strided_slice %34 {offsets = [0, 128], sizes = [32, 128], strides = [1, 1]} : vector<32x384xf32> to vector<32x128xf32>
    %43 = arith.addf %41, %42 : vector<32x128xf32>
    %44 = vector.extract_strided_slice %34 {offsets = [0, 256], sizes = [32, 128], strides = [1, 1]} : vector<32x384xf32> to vector<32x128xf32>
    %c31_i32 = arith.constant 31 : i32
    %45 = tpu.dynamic_rotate %44 by %c31_i32 dim 0 : vector<32x128xf32>, i32 -> vector<32x128xf32>
    %cst_17 = arith.constant 0.000000e+00 : f32
    %46 = vector.broadcast %cst_17 : f32 to vector<32x128xf32>
    %47 = arith.select %30, %45, %46 : vector<32x128xi1>, vector<32x128xf32>
    %48 = arith.addf %43, %47 : vector<32x128xf32>
    %49 = vector.shape_cast %48 : vector<32x128xf32> to vector<2x16x128xf32>
    %50 = arith.truncf %49 : vector<2x16x128xf32> to vector<2x16x128xbf16>
    %c0_18 = arith.constant 0 : index
    %c0_19 = arith.constant 0 : index
    %c0_20 = arith.constant 0 : index
    %51 = vector.load %arg6[%c0_18, %c0_19, %c0_20] : memref<2x16x128xbf16, #tpu.memory_space<vmem>>, vector<2x16x128xbf16>
    tpu.vector_store %arg6[%c0_18, %c0_19, %c0_20], %50 {strides = array<i32>} : memref<2x16x128xbf16, #tpu.memory_space<vmem>>, vector<2x16x128xbf16>,
    %cst_21 = arith.constant dense<0.000000e+00> : vector<128xf32>
    %52 = vector.multi_reduction <add>, %48, %cst_21 [0] : vector<32x128xf32> to vector<128xf32>
    %53 = vector.shape_cast %52 : vector<128xf32> to vector<1x128xf32>
    %54 = vector.shape_cast %53 : vector<1x128xf32> to vector<1x1x128xf32>
    %c0_22 = arith.constant 0 : index
    %c0_23 = arith.constant 0 : index
    %c0_24 = arith.constant 0 : index
    %55 = vector.load %arg7[%c0_22, %c0_23, %c0_24] : memref<1x1x128xf32, #tpu.memory_space<vmem>>, vector<1x1x128xf32>
    tpu.vector_store %arg7[%c0_22, %c0_23, %c0_24], %54 {strides = array<i32>} : memref<1x1x128xf32, #tpu.memory_space<vmem>>, vector<1x1x128xf32>,
    %56 = arith.mulf %48, %48 : vector<32x128xf32>
    %cst_25 = arith.constant dense<0.000000e+00> : vector<128xf32>
    %57 = vector.multi_reduction <add>, %56, %cst_25 [0] : vector<32x128xf32> to vector<128xf32>
    %58 = vector.shape_cast %57 : vector<128xf32> to vector<1x128xf32>
    %59 = vector.shape_cast %58 : vector<1x128xf32> to vector<1x1x128xf32>
    %c0_26 = arith.constant 0 : index
    %c0_27 = arith.constant 0 : index
    %c0_28 = arith.constant 0 : index
    %60 = vector.load %arg8[%c0_26, %c0_27, %c0_28] : memref<1x1x128xf32, #tpu.memory_space<vmem>>, vector<1x1x128xf32>
    tpu.vector_store %arg8[%c0_26, %c0_27, %c0_28], %59 {strides = array<i32>} : memref<1x1x128xf32, #tpu.memory_space<vmem>>, vector<1x1x128xf32>,
    return
  }
  func.func @transform_0(%arg0: i32) -> (i32, i32, i32) {
    %c0_i32 = arith.constant 0 : i32
    %c0_i32_0 = arith.constant 0 : i32
    %c0_i32_1 = arith.constant 0 : i32
    return %arg0, %c0_i32, %c0_i32_0 : i32, i32, i32
  }
  func.func @transform_1(%arg0: i32) -> (i32, i32) {
    %c0_i32 = arith.constant 0 : i32
    %c0_i32_0 = arith.constant 0 : i32
    %c0_i32_1 = arith.constant 0 : i32
    return %c0_i32, %c0_i32_0 : i32, i32
  }
  func.func @transform_2(%arg0: i32) -> (i32, i32) {
    %c0_i32 = arith.constant 0 : i32
    %c0_i32_0 = arith.constant 0 : i32
    %c0_i32_1 = arith.constant 0 : i32
    return %c0_i32, %c0_i32_0 : i32, i32
  }
  func.func @transform_3(%arg0: i32) -> (i32, i32) {
    %c0_i32 = arith.constant 0 : i32
    %c0_i32_0 = arith.constant 0 : i32
    %c0_i32_1 = arith.constant 0 : i32
    return %c0_i32, %c0_i32_0 : i32, i32
  }
  func.func @transform_4(%arg0: i32) -> (i32, i32) {
    %c0_i32 = arith.constant 0 : i32
    %c0_i32_0 = arith.constant 0 : i32
    %c0_i32_1 = arith.constant 0 : i32
    return %c0_i32, %c0_i32_0 : i32, i32
  }
  func.func @transform_5(%arg0: i32) -> (i32, i32, i32) {
    %c0_i32 = arith.constant 0 : i32
    %c0_i32_0 = arith.constant 0 : i32
    %c0_i32_1 = arith.constant 0 : i32
    return %arg0, %c0_i32, %c0_i32_0 : i32, i32, i32
  }
  func.func @transform_6(%arg0: i32) -> (i32, i32, i32) {
    %c0_i32 = arith.constant 0 : i32
    %c0_i32_0 = arith.constant 0 : i32
    %c0_i32_1 = arith.constant 0 : i32
    return %arg0, %c0_i32, %c0_i32_0 : i32, i32, i32
  }
  func.func @transform_7(%arg0: i32) -> (i32, i32, i32) {
    %c0_i32 = arith.constant 0 : i32
    %c0_i32_0 = arith.constant 0 : i32
    %c0_i32_1 = arith.constant 0 : i32
    return %arg0, %c0_i32, %c0_i32_0 : i32, i32, i32
  }
}

module attributes {stable_mosaic.version = 11 : i64} {
  func.func @stage2_kernel(%arg0: i32, %arg1: memref<2x16x64xf32, #tpu.memory_space<vmem>>, %arg2: memref<2x16x128xbf16, #tpu.memory_space<vmem>>, %arg3: memref<1x64xf32, #tpu.memory_space<vmem>>, %arg4: memref<1x64xf32, #tpu.memory_space<vmem>>, %arg5: memref<1x128xf32, #tpu.memory_space<vmem>>, %arg6: memref<1x128xf32, #tpu.memory_space<vmem>>, %arg7: memref<64x384xbf16, #tpu.memory_space<vmem>>, %arg8: memref<128x384xbf16, #tpu.memory_space<vmem>>, %arg9: memref<1x128xf32, #tpu.memory_space<vmem>>, %arg10: memref<1x128xf32, #tpu.memory_space<vmem>>, %arg11: memref<2x16x128xf32, #tpu.memory_space<vmem>>) attributes {dimension_semantics = [#tpu.dimension_semantics<parallel>], iteration_bounds = array<i64: 1>, scalar_prefetch = 0 : i64, scratch_operands = 0 : i64, tpu.core_type = #tpu.core_type<tc>, window_params = [{transform_indices = @transform_0, window_bounds = array<i64: 2, 16, 64>}, {transform_indices = @transform_1, window_bounds = array<i64: 2, 16, 128>}, {pipeline_mode = #tpu.pipeline_mode<synchronous>, transform_indices = @transform_2, window_bounds = array<i64: 1, 64>}, {pipeline_mode = #tpu.pipeline_mode<synchronous>, transform_indices = @transform_3, window_bounds = array<i64: 1, 64>}, {pipeline_mode = #tpu.pipeline_mode<synchronous>, transform_indices = @transform_4, window_bounds = array<i64: 1, 128>}, {pipeline_mode = #tpu.pipeline_mode<synchronous>, transform_indices = @transform_5, window_bounds = array<i64: 1, 128>}, {pipeline_mode = #tpu.pipeline_mode<synchronous>, transform_indices = @transform_6, window_bounds = array<i64: 64, 384>}, {pipeline_mode = #tpu.pipeline_mode<synchronous>, transform_indices = @transform_7, window_bounds = array<i64: 128, 384>}, {pipeline_mode = #tpu.pipeline_mode<synchronous>, transform_indices = @transform_8, window_bounds = array<i64: 1, 128>}, {pipeline_mode = #tpu.pipeline_mode<synchronous>, transform_indices = @transform_9, window_bounds = array<i64: 1, 128>}, {transform_indices = @transform_10, window_bounds = array<i64: 2, 16, 128>}]} {
    %0 = tpu.iota {dimensions = array<i32: 0>} : vector<32x128xi32>
    %c16_i32 = arith.constant 16 : i32
    %c0_i32 = arith.constant 0 : i32
    %1 = arith.cmpi eq, %c16_i32, %c0_i32 : i32
    %c1_i32 = arith.constant 1 : i32
    %2 = arith.select %1, %c1_i32, %c16_i32 : i32
    %3 = vector.broadcast %2 : i32 to vector<32x128xi32>
    %4 = arith.remsi %0, %3 : vector<32x128xi32>
    %c0_i32_0 = arith.constant 0 : i32
    %5 = vector.broadcast %c0_i32_0 : i32 to vector<32x128xi32>
    %6 = arith.cmpi ne, %4, %5 : vector<32x128xi32>
    %c0_i32_1 = arith.constant 0 : i32
    %7 = vector.broadcast %c0_i32_1 : i32 to vector<32x128xi32>
    %8 = arith.cmpi slt, %4, %7 : vector<32x128xi32>
    %c0_i32_2 = arith.constant 0 : i32
    %9 = arith.cmpi slt, %2, %c0_i32_2 : i32
    %10 = vector.broadcast %9 : i1 to vector<32x128xi1>
    %11 = vector.broadcast %10 : vector<32x128xi1> to vector<32x128xi1>
    %12 = arith.xori %8, %11 : vector<32x128xi1>
    %13 = arith.andi %12, %6 : vector<32x128xi1>
    %14 = vector.broadcast %2 : i32 to vector<32x128xi32>
    %15 = arith.addi %4, %14 : vector<32x128xi32>
    %16 = arith.select %13, %15, %4 : vector<32x128xi1>, vector<32x128xi32>
    %c1_i32_3 = arith.constant 1 : i32
    %17 = vector.broadcast %c1_i32_3 : i32 to vector<32x128xi32>
    %18 = arith.cmpi sge, %16, %17 : vector<32x128xi32>
    %c15_i32 = arith.constant 15 : i32
    %19 = vector.broadcast %c15_i32 : i32 to vector<32x128xi32>
    %20 = arith.cmpi slt, %16, %19 : vector<32x128xi32>
    %c0 = arith.constant 0 : index
    %c0_4 = arith.constant 0 : index
    %c0_5 = arith.constant 0 : index
    %21 = vector.load %arg1[%c0, %c0_4, %c0_5] : memref<2x16x64xf32, #tpu.memory_space<vmem>>, vector<2x16x64xf32>
    %22 = vector.shape_cast %21 : vector<2x16x64xf32> to vector<32x64xf32>
    %c0_6 = arith.constant 0 : index
    %c0_7 = arith.constant 0 : index
    %23 = vector.load %arg3[%c0_6, %c0_7] : memref<1x64xf32, #tpu.memory_space<vmem>>, vector<1x64xf32>
    %24 = vector.broadcast %23 : vector<1x64xf32> to vector<32x64xf32>
    %25 = arith.mulf %22, %24 : vector<32x64xf32>
    %c0_8 = arith.constant 0 : index
    %c0_9 = arith.constant 0 : index
    %26 = vector.load %arg4[%c0_8, %c0_9] : memref<1x64xf32, #tpu.memory_space<vmem>>, vector<1x64xf32>
    %27 = vector.broadcast %26 : vector<1x64xf32> to vector<32x64xf32>
    %28 = arith.addf %25, %27 : vector<32x64xf32>
    %c0_10 = arith.constant 0 : index
    %c0_11 = arith.constant 0 : index
    %29 = vector.load %arg7[%c0_10, %c0_11] : memref<64x384xbf16, #tpu.memory_space<vmem>>, vector<64x384xbf16>
    %c0_12 = arith.constant 0 : index
    %c0_13 = arith.constant 0 : index
    %30 = vector.load %arg9[%c0_12, %c0_13] : memref<1x128xf32, #tpu.memory_space<vmem>>, vector<1x128xf32>
    %31 = arith.truncf %28 : vector<32x64xf32> to vector<32x64xbf16>
    %cst = arith.constant dense<0.000000e+00> : vector<32x384xf32>
    %32 = tpu.matmul %31, %29, %cst {dimension_numbers = #tpu.dot_dimension_numbers<[1], [0], [0], [1], [0, 0, 1, 1], [], []>} : vector<32x64xbf16>, vector<64x384xbf16>, vector<32x384xf32> -> vector<32x384xf32>
    %33 = vector.shape_cast %30 : vector<1x128xf32> to vector<1x128xf32>
    %34 = vector.broadcast %33 : vector<1x128xf32> to vector<32x128xf32>
    %35 = vector.extract_strided_slice %32 {offsets = [0, 0], sizes = [32, 128], strides = [1, 1]} : vector<32x384xf32> to vector<32x128xf32>
    %c1_i32_14 = arith.constant 1 : i32
    %36 = tpu.dynamic_rotate %35 by %c1_i32_14 dim 0 : vector<32x128xf32>, i32 -> vector<32x128xf32>
    %cst_15 = arith.constant 0.000000e+00 : f32
    %37 = vector.broadcast %cst_15 : f32 to vector<32x128xf32>
    %38 = arith.select %18, %36, %37 : vector<32x128xi1>, vector<32x128xf32>
    %39 = arith.addf %34, %38 : vector<32x128xf32>
    %40 = vector.extract_strided_slice %32 {offsets = [0, 128], sizes = [32, 128], strides = [1, 1]} : vector<32x384xf32> to vector<32x128xf32>
    %41 = arith.addf %39, %40 : vector<32x128xf32>
    %42 = vector.extract_strided_slice %32 {offsets = [0, 256], sizes = [32, 128], strides = [1, 1]} : vector<32x384xf32> to vector<32x128xf32>
    %c31_i32 = arith.constant 31 : i32
    %43 = tpu.dynamic_rotate %42 by %c31_i32 dim 0 : vector<32x128xf32>, i32 -> vector<32x128xf32>
    %cst_16 = arith.constant 0.000000e+00 : f32
    %44 = vector.broadcast %cst_16 : f32 to vector<32x128xf32>
    %45 = arith.select %20, %43, %44 : vector<32x128xi1>, vector<32x128xf32>
    %46 = arith.addf %41, %45 : vector<32x128xf32>
    %c0_17 = arith.constant 0 : index
    %c0_18 = arith.constant 0 : index
    %c0_19 = arith.constant 0 : index
    %47 = vector.load %arg2[%c0_17, %c0_18, %c0_19] : memref<2x16x128xbf16, #tpu.memory_space<vmem>>, vector<2x16x128xbf16>
    %48 = vector.shape_cast %47 : vector<2x16x128xbf16> to vector<32x128xbf16>
    %49 = arith.extf %48 : vector<32x128xbf16> to vector<32x128xf32>
    %c0_20 = arith.constant 0 : index
    %c0_21 = arith.constant 0 : index
    %50 = vector.load %arg5[%c0_20, %c0_21] : memref<1x128xf32, #tpu.memory_space<vmem>>, vector<1x128xf32>
    %51 = vector.broadcast %50 : vector<1x128xf32> to vector<32x128xf32>
    %52 = arith.mulf %49, %51 : vector<32x128xf32>
    %c0_22 = arith.constant 0 : index
    %c0_23 = arith.constant 0 : index
    %53 = vector.load %arg6[%c0_22, %c0_23] : memref<1x128xf32, #tpu.memory_space<vmem>>, vector<1x128xf32>
    %54 = vector.broadcast %53 : vector<1x128xf32> to vector<32x128xf32>
    %55 = arith.addf %52, %54 : vector<32x128xf32>
    %cst_24 = arith.constant 0.000000e+00 : f32
    %56 = vector.broadcast %cst_24 : f32 to vector<32x128xf32>
    %57 = arith.maximumf %55, %56 : vector<32x128xf32>
    %c0_25 = arith.constant 0 : index
    %c0_26 = arith.constant 0 : index
    %58 = vector.load %arg8[%c0_25, %c0_26] : memref<128x384xbf16, #tpu.memory_space<vmem>>, vector<128x384xbf16>
    %c0_27 = arith.constant 0 : index
    %c0_28 = arith.constant 0 : index
    %59 = vector.load %arg10[%c0_27, %c0_28] : memref<1x128xf32, #tpu.memory_space<vmem>>, vector<1x128xf32>
    %60 = arith.truncf %57 : vector<32x128xf32> to vector<32x128xbf16>
    %cst_29 = arith.constant dense<0.000000e+00> : vector<32x384xf32>
    %61 = tpu.matmul %60, %58, %cst_29 {dimension_numbers = #tpu.dot_dimension_numbers<[1], [0], [0], [1], [0, 0, 1, 1], [], []>} : vector<32x128xbf16>, vector<128x384xbf16>, vector<32x384xf32> -> vector<32x384xf32>
    %62 = vector.shape_cast %59 : vector<1x128xf32> to vector<1x128xf32>
    %63 = vector.broadcast %62 : vector<1x128xf32> to vector<32x128xf32>
    %64 = vector.extract_strided_slice %61 {offsets = [0, 0], sizes = [32, 128], strides = [1, 1]} : vector<32x384xf32> to vector<32x128xf32>
    %c1_i32_30 = arith.constant 1 : i32
    %65 = tpu.dynamic_rotate %64 by %c1_i32_30 dim 0 : vector<32x128xf32>, i32 -> vector<32x128xf32>
    %cst_31 = arith.constant 0.000000e+00 : f32
    %66 = vector.broadcast %cst_31 : f32 to vector<32x128xf32>
    %67 = arith.select %18, %65, %66 : vector<32x128xi1>, vector<32x128xf32>
    %68 = arith.addf %63, %67 : vector<32x128xf32>
    %69 = vector.extract_strided_slice %61 {offsets = [0, 128], sizes = [32, 128], strides = [1, 1]} : vector<32x384xf32> to vector<32x128xf32>
    %70 = arith.addf %68, %69 : vector<32x128xf32>
    %71 = vector.extract_strided_slice %61 {offsets = [0, 256], sizes = [32, 128], strides = [1, 1]} : vector<32x384xf32> to vector<32x128xf32>
    %c31_i32_32 = arith.constant 31 : i32
    %72 = tpu.dynamic_rotate %71 by %c31_i32_32 dim 0 : vector<32x128xf32>, i32 -> vector<32x128xf32>
    %cst_33 = arith.constant 0.000000e+00 : f32
    %73 = vector.broadcast %cst_33 : f32 to vector<32x128xf32>
    %74 = arith.select %20, %72, %73 : vector<32x128xi1>, vector<32x128xf32>
    %75 = arith.addf %70, %74 : vector<32x128xf32>
    %76 = arith.addf %46, %75 : vector<32x128xf32>
    %77 = vector.shape_cast %76 : vector<32x128xf32> to vector<2x16x128xf32>
    %c0_34 = arith.constant 0 : index
    %c0_35 = arith.constant 0 : index
    %c0_36 = arith.constant 0 : index
    %78 = vector.load %arg11[%c0_34, %c0_35, %c0_36] : memref<2x16x128xf32, #tpu.memory_space<vmem>>, vector<2x16x128xf32>
    tpu.vector_store %arg11[%c0_34, %c0_35, %c0_36], %77 {strides = array<i32>} : memref<2x16x128xf32, #tpu.memory_space<vmem>>, vector<2x16x128xf32>,
    return
  }
  func.func @transform_0(%arg0: i32) -> (i32, i32, i32) {
    %c0_i32 = arith.constant 0 : i32
    %c0_i32_0 = arith.constant 0 : i32
    %c0_i32_1 = arith.constant 0 : i32
    return %arg0, %c0_i32, %c0_i32_0 : i32, i32, i32
  }
  func.func @transform_1(%arg0: i32) -> (i32, i32, i32) {
    %c0_i32 = arith.constant 0 : i32
    %c0_i32_0 = arith.constant 0 : i32
    %c0_i32_1 = arith.constant 0 : i32
    return %arg0, %c0_i32, %c0_i32_0 : i32, i32, i32
  }
  func.func @transform_2(%arg0: i32) -> (i32, i32) {
    %c0_i32 = arith.constant 0 : i32
    %c0_i32_0 = arith.constant 0 : i32
    %c0_i32_1 = arith.constant 0 : i32
    return %c0_i32, %c0_i32_0 : i32, i32
  }
  func.func @transform_3(%arg0: i32) -> (i32, i32) {
    %c0_i32 = arith.constant 0 : i32
    %c0_i32_0 = arith.constant 0 : i32
    %c0_i32_1 = arith.constant 0 : i32
    return %c0_i32, %c0_i32_0 : i32, i32
  }
  func.func @transform_4(%arg0: i32) -> (i32, i32) {
    %c0_i32 = arith.constant 0 : i32
    %c0_i32_0 = arith.constant 0 : i32
    %c0_i32_1 = arith.constant 0 : i32
    return %c0_i32, %c0_i32_0 : i32, i32
  }
  func.func @transform_5(%arg0: i32) -> (i32, i32) {
    %c0_i32 = arith.constant 0 : i32
    %c0_i32_0 = arith.constant 0 : i32
    %c0_i32_1 = arith.constant 0 : i32
    return %c0_i32, %c0_i32_0 : i32, i32
  }
  func.func @transform_6(%arg0: i32) -> (i32, i32) {
    %c0_i32 = arith.constant 0 : i32
    %c0_i32_0 = arith.constant 0 : i32
    %c0_i32_1 = arith.constant 0 : i32
    return %c0_i32, %c0_i32_0 : i32, i32
  }
  func.func @transform_7(%arg0: i32) -> (i32, i32) {
    %c0_i32 = arith.constant 0 : i32
    %c0_i32_0 = arith.constant 0 : i32
    %c0_i32_1 = arith.constant 0 : i32
    return %c0_i32, %c0_i32_0 : i32, i32
  }
  func.func @transform_8(%arg0: i32) -> (i32, i32) {
    %c0_i32 = arith.constant 0 : i32
    %c0_i32_0 = arith.constant 0 : i32
    %c0_i32_1 = arith.constant 0 : i32
    return %c0_i32, %c0_i32_0 : i32, i32
  }
  func.func @transform_9(%arg0: i32) -> (i32, i32) {
    %c0_i32 = arith.constant 0 : i32
    %c0_i32_0 = arith.constant 0 : i32
    %c0_i32_1 = arith.constant 0 : i32
    return %c0_i32, %c0_i32_0 : i32, i32
  }
  func.func @transform_10(%arg0: i32) -> (i32, i32, i32) {
    %c0_i32 = arith.constant 0 : i32
    %c0_i32_0 = arith.constant 0 : i32
    %c0_i32_1 = arith.constant 0 : i32
    return %arg0, %c0_i32, %c0_i32_0 : i32, i32, i32
  }
}

</mosaic_0001>

<bundles_post_ra>
// kernel: tile.73
= control target key start
LH: loop header
LB: loop body
LE: loop exit
PB: predicated region body
PF: predicated region fallthrough
CT: control target
= control target key end

     0   :  { %s28_s0 = inlined_call_operand.vmem [shape: f32[4], index: 0, kind: input, shape index: {}]   ;;  %s29_s1 = inlined_call_operand.vmem [shape: f32[16,4], index: 1, kind: output, shape index: {}]  }
   0x1   :  { %v4_v0 = vld [vmem:[%s28_s0] ss:$0 sm:$0xff] }
   0x2   :  { %5 = vst [vmem:[%s29_s1] sm:$0xff] %v4_v0  ;;  %8 = vst [vmem:[%s29_s1 + $0x8] sm:$0xff] %v4_v0 }

// kernel: tile.74
= control target key start
LH: loop header
LB: loop body
LE: loop exit
PB: predicated region body
PF: predicated region fallthrough
CT: control target
= control target key end

     0   :  { %s133_s10 = smov 60   ;;  %s134_s11 = smov 52   ;;  %vm3_vm0 = vcmask 31744   ;;  %vm9_vm1 = vcmask 523744   ;;  %vm15_vm2 = vcmask 490944   ;;  %vm21_vm3 = vcmask 458144   ;;  %s209_s0 = inlined_call_operand.vmem [shape: f32[16,4], index: 0, kind: input, shape index: {}]   ;;  %s210_s1 = inlined_call_operand.vmem [shape: f32[1,64], index: 1, kind: output, shape index: {}]  }
   0x1   :  { %v103_v0 = vld [vmem:[%s209_s0 + $0xf] sm:$0x1]   ;;  %v105_v1 = vld [vmem:[%s209_s0 + $0xd] sm:$0x1]   ;;  %v104_v2 = vld [vmem:[%s209_s0 + $0xe] sm:$0x1]  }
   0x2   :  { %7 = vrot.lane.b32.xlu0 %v103_v0, %s133_s10  ;;  %19 = vrot.lane.b32.xlu1 %v105_v1, %s134_s11  ;;  %v106_v3 = vld [vmem:[%s209_s0 + $0xc] sm:$0x1]   ;;  %s135_s16 = smov 56   ;;  %s136_s17 = smov 48   ;;  %v107_v4 = vld [vmem:[%s209_s0 + $0xb] sm:$0x1]  }
   0x3   :  { %v108_v5 = vld [vmem:[%s209_s0 + $0xa] sm:$0x1]   ;;  %v2_v6 = vld [vmem:[%s209_s0] sm:$0x1]   ;;  %s137_s24 = smov 44   ;;  %s138_s25 = smov 40  }
   0x4   :  { %4 = vst.msk [vmem:[#allocation0] sm:$0x1] %vm3_vm0, %v2_v6   ;;  %v109_v7 = vld [vmem:[%s209_s0 + $0x9] sm:$0x1]   ;;  %v110_v8 = vld [vmem:[%s209_s0 + $0x8] sm:$0x1]  }
   0x5   :  { %s139_s30 = smov 36   ;;  %s140_s2 = smov 32   ;;  %v111_v9 = vld [vmem:[%s209_s0 + $0x7] sm:$0x1]   ;;  %v112_v10 = vld [vmem:[%s209_s0 + $0x6] sm:$0x1]  }
   0x6   :  { %13 = vrot.lane.b32.xlu0 %v104_v2, %s135_s16  ;;  %25 = vrot.lane.b32.xlu1 %v106_v3, %s136_s17  ;;  %s141_s7 = smov 28   ;;  %s142_s8 = smov 24   ;;  %v113_v11 = vld [vmem:[%s209_s0 + $0x5] sm:$0x1]   ;;  %v114_v12 = vld [vmem:[%s209_s0 + $0x4] sm:$0x1]  }
   0x7   :  { %s143_s13 = smov 20   ;;  %s144_s14 = smov 16   ;;  %v115_v13 = vld [vmem:[%s209_s0 + $0x3] sm:$0x1]   ;;  %v116_v14 = vld [vmem:[%s209_s0 + $0x2] sm:$0x1]  }
   0x8   :  { %s145_s19 = smov 12   ;;  %s146_s20 = smov 8   ;;  %v117_v15 = vld [vmem:[%s209_s0 + $0x1] sm:$0x1]   ;;  %vm27_vm4 = vcmask 425344   ;;  %vm33_vm5 = vcmask 392544  }
   0x9   :  { %s147_s0 = smov 4   ;;  %vm39_vm6 = vcmask 359744   ;;  %vm45_vm7 = vcmask 326944   ;;  %vm51_vm8 = vcmask 294144   ;;  %vm57_vm9 = vcmask 261344  }
   0xa   :  { %31 = vrot.lane.b32.xlu0 %v107_v4, %s137_s24  ;;  %37 = vrot.lane.b32.xlu1 %v108_v5, %s138_s25  ;;  %vm63_vm10 = vcmask 228544   ;;  %vm69_vm11 = vcmask 195744   ;;  %vm75_vm12 = vcmask 162944   ;;  %vm81_vm13 = vcmask 130144  }
   0xb   :  { %vm87_vm14 = vcmask 97344   ;;  %vm93_vm15 = vcmask 64544  }
   0xe   :  { %43 = vrot.lane.b32.xlu0 %v109_v7, %s139_s30  ;;  %49 = vrot.lane.b32.xlu1 %v110_v8, %s140_s2 }
  0x12   :  { %55 = vrot.lane.b32.xlu0 %v111_v9, %s141_s7  ;;  %61 = vrot.lane.b32.xlu1 %v112_v10, %s142_s8 }
  0x16   :  { %67 = vrot.lane.b32.xlu0 %v113_v11, %s143_s13  ;;  %73 = vrot.lane.b32.xlu1 %v114_v12, %s144_s14 }
  0x1a   :  { %79 = vrot.lane.b32.xlu0 %v115_v13, %s145_s19  ;;  %85 = vrot.lane.b32.xlu1 %v116_v14, %s146_s20 }
  0x1e   :  { %91 = vrot.lane.b32.xlu0 %v117_v15, %s147_s0 }
  0x74   :  { %v8_v16 = vpop.permute.xlu0 %7   ;;  %v20_v17 = vpop.permute.xlu1 %19  }
  0x75   :  { %10 = vst.msk [vmem:[#allocation0] sm:$0x1] %vm9_vm1, %v8_v16  }
  0x78   :  { %v14_v18 = vpop.permute.xlu0 %13   ;;  %v26_v19 = vpop.permute.xlu1 %25  }
  0x79   :  { %16 = vst.msk [vmem:[#allocation0] sm:$0x1] %vm15_vm2, %v14_v18  }
  0x7a   :  { %22 = vst.msk [vmem:[#allocation0] sm:$0x1] %vm21_vm3, %v20_v17  }
  0x7b   :  { %28 = vst.msk [vmem:[#allocation0] sm:$0x1] %vm27_vm4, %v26_v19  }
  0x7c   :  { %v32_v20 = vpop.permute.xlu0 %31   ;;  %v38_v21 = vpop.permute.xlu1 %37  }
  0x7d   :  { %34 = vst.msk [vmem:[#allocation0] sm:$0x1] %vm33_vm5, %v32_v20  }
  0x7e   :  { %40 = vst.msk [vmem:[#allocation0] sm:$0x1] %vm39_vm6, %v38_v21  }
  0x80   :  { %v44_v22 = vpop.permute.xlu0 %43   ;;  %v50_v23 = vpop.permute.xlu1 %49  }
  0x81   :  { %46 = vst.msk [vmem:[#allocation0] sm:$0x1] %vm45_vm7, %v44_v22  }
  0x82   :  { %52 = vst.msk [vmem:[#allocation0] sm:$0x1] %vm51_vm8, %v50_v23  }
  0x84   :  { %v56_v24 = vpop.permute.xlu0 %55   ;;  %v62_v25 = vpop.permute.xlu1 %61  }
  0x85   :  { %58 = vst.msk [vmem:[#allocation0] sm:$0x1] %vm57_vm9, %v56_v24  }
  0x86   :  { %64 = vst.msk [vmem:[#allocation0] sm:$0x1] %vm63_vm10, %v62_v25  }
  0x88   :  { %v68_v26 = vpop.permute.xlu0 %67   ;;  %v74_v27 = vpop.permute.xlu1 %73  }
  0x89   :  { %70 = vst.msk [vmem:[#allocation0] sm:$0x1] %vm69_vm11, %v68_v26  }
  0x8a   :  { %76 = vst.msk [vmem:[#allocation0] sm:$0x1] %vm75_vm12, %v74_v27  }
  0x8c   :  { %v80_v28 = vpop.permute.xlu0 %79   ;;  %v86_v29 = vpop.permute.xlu1 %85  }
  0x8d   :  { %82 = vst.msk [vmem:[#allocation0] sm:$0x1] %vm81_vm13, %v80_v28  }
  0x8e   :  { %88 = vst.msk [vmem:[#allocation0] sm:$0x1] %vm87_vm14, %v86_v29  }
  0x90   :  { %v92_v30 = vpop.permute.xlu0 %91  }
  0x91   :  { %94 = vst.msk [vmem:[#allocation0] sm:$0x1] %vm93_vm15, %v92_v30  }
  0x98   :  { %v99_v31 = vld [vmem:[#allocation0] sm:$0x1] }
  0x99   :  { %102 = vst [vmem:[%s210_s1] sm:$0x1] %v99_v31 }

// kernel: tile.53
= control target key start
LH: loop header
LB: loop body
LE: loop exit
PB: predicated region body
PF: predicated region fallthrough
CT: control target
= control target key end

     0   :  { %s28_s0 = inlined_call_operand.vmem [shape: f32[8], index: 0, kind: input, shape index: {}]   ;;  %s29_s1 = inlined_call_operand.vmem [shape: f32[16,8], index: 1, kind: output, shape index: {}]  }
   0x1   :  { %v4_v0 = vld [vmem:[%s28_s0] ss:$0 sm:$0xff] }
   0x2   :  { %5 = vst [vmem:[%s29_s1] sm:$0xff] %v4_v0  ;;  %8 = vst [vmem:[%s29_s1 + $0x8] sm:$0xff] %v4_v0 }

// kernel: tile.54
= control target key start
LH: loop header
LB: loop body
LE: loop exit
PB: predicated region body
PF: predicated region fallthrough
CT: control target
= control target key end

     0   :  { %s133_s10 = smov 120   ;;  %s134_s11 = smov 104   ;;  %vm3_vm0 = vcmask 64512   ;;  %vm9_vm1 = vcmask 1048512   ;;  %vm15_vm2 = vcmask 982912   ;;  %vm21_vm3 = vcmask 917312   ;;  %s209_s0 = inlined_call_operand.vmem [shape: f32[16,8], index: 0, kind: input, shape index: {}]   ;;  %s210_s1 = inlined_call_operand.vmem [shape: f32[1,128], index: 1, kind: output, shape index: {}]  }
   0x1   :  { %v103_v0 = vld [vmem:[%s209_s0 + $0xf] sm:$0x1]   ;;  %v105_v1 = vld [vmem:[%s209_s0 + $0xd] sm:$0x1]   ;;  %v104_v2 = vld [vmem:[%s209_s0 + $0xe] sm:$0x1]  }
   0x2   :  { %7 = vrot.lane.b32.xlu0 %v103_v0, %s133_s10  ;;  %19 = vrot.lane.b32.xlu1 %v105_v1, %s134_s11  ;;  %v106_v3 = vld [vmem:[%s209_s0 + $0xc] sm:$0x1]   ;;  %s135_s16 = smov 112   ;;  %s136_s17 = smov 96   ;;  %v107_v4 = vld [vmem:[%s209_s0 + $0xb] sm:$0x1]  }
   0x3   :  { %v108_v5 = vld [vmem:[%s209_s0 + $0xa] sm:$0x1]   ;;  %v2_v6 = vld [vmem:[%s209_s0] sm:$0x1]   ;;  %s137_s24 = smov 88   ;;  %s138_s25 = smov 80  }
   0x4   :  { %4 = vst.msk [vmem:[#allocation0] sm:$0x1] %vm3_vm0, %v2_v6   ;;  %v109_v7 = vld [vmem:[%s209_s0 + $0x9] sm:$0x1]   ;;  %v110_v8 = vld [vmem:[%s209_s0 + $0x8] sm:$0x1]  }
   0x5   :  { %s139_s30 = smov 72   ;;  %s140_s2 = smov 64   ;;  %v111_v9 = vld [vmem:[%s209_s0 + $0x7] sm:$0x1]   ;;  %v112_v10 = vld [vmem:[%s209_s0 + $0x6] sm:$0x1]  }
   0x6   :  { %13 = vrot.lane.b32.xlu0 %v104_v2, %s135_s16  ;;  %25 = vrot.lane.b32.xlu1 %v106_v3, %s136_s17  ;;  %s141_s7 = smov 56   ;;  %s142_s8 = smov 48   ;;  %v113_v11 = vld [vmem:[%s209_s0 + $0x5] sm:$0x1]   ;;  %v114_v12 = vld [vmem:[%s209_s0 + $0x4] sm:$0x1]  }
   0x7   :  { %s143_s13 = smov 40   ;;  %s144_s14 = smov 32   ;;  %v115_v13 = vld [vmem:[%s209_s0 + $0x3] sm:$0x1]   ;;  %v116_v14 = vld [vmem:[%s209_s0 + $0x2] sm:$0x1]  }
   0x8   :  { %s145_s19 = smov 24   ;;  %s146_s20 = smov 16   ;;  %v117_v15 = vld [vmem:[%s209_s0 + $0x1] sm:$0x1]   ;;  %vm27_vm4 = vcmask 851712   ;;  %vm33_vm5 = vcmask 786112  }
   0x9   :  { %s147_s0 = smov 8   ;;  %vm39_vm6 = vcmask 720512   ;;  %vm45_vm7 = vcmask 654912   ;;  %vm51_vm8 = vcmask 589312   ;;  %vm57_vm9 = vcmask 523712  }
   0xa   :  { %31 = vrot.lane.b32.xlu0 %v107_v4, %s137_s24  ;;  %37 = vrot.lane.b32.xlu1 %v108_v5, %s138_s25  ;;  %vm63_vm10 = vcmask 458112   ;;  %vm69_vm11 = vcmask 392512   ;;  %vm75_vm12 = vcmask 326912   ;;  %vm81_vm13 = vcmask 261312  }
   0xb   :  { %vm87_vm14 = vcmask 195712   ;;  %vm93_vm15 = vcmask 130112  }
   0xe   :  { %43 = vrot.lane.b32.xlu0 %v109_v7, %s139_s30  ;;  %49 = vrot.lane.b32.xlu1 %v110_v8, %s140_s2 }
  0x12   :  { %55 = vrot.lane.b32.xlu0 %v111_v9, %s141_s7  ;;  %61 = vrot.lane.b32.xlu1 %v112_v10, %s142_s8 }
  0x16   :  { %67 = vrot.lane.b32.xlu0 %v113_v11, %s143_s13  ;;  %73 = vrot.lane.b32.xlu1 %v114_v12, %s144_s14 }
  0x1a   :  { %79 = vrot.lane.b32.xlu0 %v115_v13, %s145_s19  ;;  %85 = vrot.lane.b32.xlu1 %v116_v14, %s146_s20 }
  0x1e   :  { %91 = vrot.lane.b32.xlu0 %v117_v15, %s147_s0 }
  0x74   :  { %v8_v16 = vpop.permute.xlu0 %7   ;;  %v20_v17 = vpop.permute.xlu1 %19  }
  0x75   :  { %10 = vst.msk [vmem:[#allocation0] sm:$0x1] %vm9_vm1, %v8_v16  }
  0x78   :  { %v14_v18 = vpop.permute.xlu0 %13   ;;  %v26_v19 = vpop.permute.xlu1 %25  }
  0x79   :  { %16 = vst.msk [vmem:[#allocation0] sm:$0x1] %vm15_vm2, %v14_v18  }
  0x7a   :  { %22 = vst.msk [vmem:[#allocation0] sm:$0x1] %vm21_vm3, %v20_v17  }
  0x7b   :  { %28 = vst.msk [vmem:[#allocation0] sm:$0x1] %vm27_vm4, %v26_v19  }
  0x7c   :  { %v32_v20 = vpop.permute.xlu0 %31   ;;  %v38_v21 = vpop.permute.xlu1 %37  }
  0x7d   :  { %34 = vst.msk [vmem:[#allocation0] sm:$0x1] %vm33_vm5, %v32_v20  }
  0x7e   :  { %40 = vst.msk [vmem:[#allocation0] sm:$0x1] %vm39_vm6, %v38_v21  }
  0x80   :  { %v44_v22 = vpop.permute.xlu0 %43   ;;  %v50_v23 = vpop.permute.xlu1 %49  }
  0x81   :  { %46 = vst.msk [vmem:[#allocation0] sm:$0x1] %vm45_vm7, %v44_v22  }
  0x82   :  { %52 = vst.msk [vmem:[#allocation0] sm:$0x1] %vm51_vm8, %v50_v23  }
  0x84   :  { %v56_v24 = vpop.permute.xlu0 %55   ;;  %v62_v25 = vpop.permute.xlu1 %61  }
  0x85   :  { %58 = vst.msk [vmem:[#allocation0] sm:$0x1] %vm57_vm9, %v56_v24  }
  0x86   :  { %64 = vst.msk [vmem:[#allocation0] sm:$0x1] %vm63_vm10, %v62_v25  }
  0x88   :  { %v68_v26 = vpop.permute.xlu0 %67   ;;  %v74_v27 = vpop.permute.xlu1 %73  }
  0x89   :  { %70 = vst.msk [vmem:[#allocation0] sm:$0x1] %vm69_vm11, %v68_v26  }
  0x8a   :  { %76 = vst.msk [vmem:[#allocation0] sm:$0x1] %vm75_vm12, %v74_v27  }
  0x8c   :  { %v80_v28 = vpop.permute.xlu0 %79   ;;  %v86_v29 = vpop.permute.xlu1 %85  }
  0x8d   :  { %82 = vst.msk [vmem:[#allocation0] sm:$0x1] %vm81_vm13, %v80_v28  }
  0x8e   :  { %88 = vst.msk [vmem:[#allocation0] sm:$0x1] %vm87_vm14, %v86_v29  }
  0x90   :  { %v92_v30 = vpop.permute.xlu0 %91  }
  0x91   :  { %94 = vst.msk [vmem:[#allocation0] sm:$0x1] %vm93_vm15, %v92_v30  }
  0x98   :  { %v99_v31 = vld [vmem:[#allocation0] sm:$0x1] }
  0x99   :  { %102 = vst [vmem:[%s210_s1] sm:$0x1] %v99_v31 }

// kernel: double_conv2d_forward.2
= control target key start
LH: loop header
LB: loop body
LE: loop exit
PB: predicated region body
PF: predicated region fallthrough
CT: control target
= control target key end

     0   :  { %v480_v1 = vmov 0   ;;  %vm198_vm0 = vcmask 523264   ;;  %v54_v33 = vlaneseq  ;;  %s616_s3 = inlined_call_operand.vmem [shape: bf16[64,384], index: 3, kind: input, shape index: {}]   ;;  %s617_s0 = inlined_call_operand.vmem [shape: f32[2,16,64], index: 0, kind: input, shape index: {}]   ;;  %s618_s1 = inlined_call_operand.vmem [shape: f32[1,64], index: 1, kind: input, shape index: {}]   ;;  %s619_s2 = inlined_call_operand.vmem [shape: f32[1,64], index: 2, kind: input, shape index: {}]   ;;  %s620_s4 = inlined_call_operand.vmem [shape: f32[1,128], index: 4, kind: input, shape index: {}]   ;;  %s621_s5 = inlined_call_operand.vmem [shape: bf16[2,16,128], index: 5, kind: output, shape index: {0}]   ;;  %s622_s6 = inlined_call_operand.vmem [shape: f32[1,1,128], index: 6, kind: output, shape index: {1}]   ;;  %s623_s7 = inlined_call_operand.vmem [shape: f32[1,1,128], index: 7, kind: output, shape index: {2}]  }
   0x1   :  { %v464_v0 = vld [vmem:[%s616_s3 + $0x4c] ss:$12 sps:$4 sm:$0xff]   ;;  %237 = vmatprep.mubr.bf16.mxu0 %v480_v1  ;;  %v466_v2 = vld [vmem:[%s616_s3 + $0x48] ss:$12 sps:$4 sm:$0xff]   ;;  %v467_v3 = vld [vmem:[%s616_s3 + $0x50] ss:$12 sps:$4 sm:$0xff]  }
   0x2   :  { %213 = vmatprep.subr.bf16.mxu0 %v464_v0  ;;  %v468_v4 = vld [vmem:[%s616_s3 + $0x34] ss:$12 sps:$4 sm:$0xff]   ;;  %v470_v5 = vld [vmem:[%s616_s3 + $0x30] ss:$12 sps:$4 sm:$0xff]   ;;  %451 = vmatprep.subr.bf16.mxu1 %v467_v3  ;;  %v471_v6 = vld [vmem:[%s616_s3 + $0x38] ss:$12 sps:$4 sm:$0xff]  }
   0x3   :  { %214 = vmatpush1.bf16.msra.mxu0 %v466_v2  ;;  %452 = vmatpush3.bf16.msra.mxu1 %v467_v3  ;;  %v472_v7 = vld [vmem:[%s616_s3 + $0x1c] ss:$12 sps:$4 sm:$0xff]   ;;  %v475_v8 = vld [vmem:[%s616_s3 + $0x20] ss:$12 sps:$4 sm:$0xff]   ;;  %v474_v9 = vld [vmem:[%s616_s3 + $0x18] ss:$12 sps:$4 sm:$0xff]  }
   0x4   :  { %215 = vmatprep.subr.bf16.mxu0 %v468_v4  ;;  %453 = vmatprep.subr.bf16.mxu1 %v471_v6  ;;  %v476_v10 = vld [vmem:[%s616_s3 + $0x4] ss:$12 sps:$4 sm:$0xff]   ;;  %v479_v11 = vld [vmem:[%s616_s3 + $0x8] ss:$12 sps:$4 sm:$0xff]   ;;  %v407_v14 = vld [vmem:[%s618_s1] ss:$0 sm:$0xff] }
   0x5   :  { %v24_v12 = vld [vmem:[%s617_s0] sm:$0xff]  ;;  %v25_v13 = vld [vmem:[%s617_s0 + $0x8] sm:$0xff]  ;;  %v26_v16 = vld [vmem:[%s617_s0 + $0x10] sm:$0xff]  ;;  %v55_v34 = vshrl.u32 %v54_v33, 7 }
   0x6   :  { %v408_v15 = vld [vmem:[%s619_s2] ss:$0 sm:$0xff]  ;;  %v35_v18 = vmul.f32 %v407_v14, %v24_v12  ;;  %v36_v19 = vmul.f32 %v407_v14, %v25_v13  ;;  %v27_v20 = vld [vmem:[%s617_s0 + $0x18] sm:$0xff]  ;;  %v37_v21 = vmul.f32 %v407_v14, %v26_v16 }
   0x7   :  { %216 = vmatpush1.bf16.msra.mxu0 %v470_v5  ;;  %454 = vmatpush3.bf16.msra.mxu1 %v471_v6  ;;  %v478_v17 = vld [vmem:[%s616_s3] ss:$12 sps:$4 sm:$0xff]   ;;  %v38_v22 = vmul.f32 %v407_v14, %v27_v20  ;;  %v57_v36 = vadd.s32 16, %v55_v34  ;;  %v56_v41 = vadd.s32 8, %v55_v34  ;;  %vm317_vm1 = vcmp.lt.s32.totalorder %v55_v34, 1 }
   0x8   :  { %217 = vmatprep.subr.bf16.mxu0 %v472_v7  ;;  %455 = vmatprep.subr.bf16.mxu1 %v475_v8  ;;  %v46_v23 = vadd.f32 %v408_v15, %v35_v18  ;;  %v47_v24 = vadd.f32 %v408_v15, %v36_v19  ;;  %v48_v25 = vadd.f32 %v408_v15, %v37_v21  ;;  %v58_v47 = vadd.s32 24, %v55_v34  ;;  %v425_v49 = vld [vmem:[%s620_s4] ss:$0 sm:$0xff] }
   0x9   :  { %v49_v26 = vadd.f32 %v408_v15, %v38_v22  ;;  %v77_v42 = vand.u32 15, %v57_v36  ;;  %v70_v51 = vand.u32 15, %v56_v41  ;;  %v63_v57 = vand.u32 15, %v55_v34 }
   0xa   :  { %v50_v27 = vmax.f32 %v46_v23, 0.0  ;;  %v51_v28 = vmax.f32 %v47_v24, 0.0  ;;  %v52_v29 = vmax.f32 %v48_v25, 0.0  ;;  %vm338_vm3 = vcmp.lt.s32.totalorder %v55_v34, 7 }
   0xb   :  { %218 = vmatpush1.bf16.msra.mxu0 %v474_v9  ;;  %456 = vmatpush3.bf16.msra.mxu1 %v475_v8  ;;  %v53_v30 = vmax.f32 %v49_v26, 0.0  ;;  %vm579_vm2 = vcmp.ge.s32.totalorder %v77_v42, 1  ;;  %v84_v59 = vand.u32 15, %v58_v47  ;;  %vm584_vm4 = vcmp.lt.s32.totalorder %v70_v51, 15 }
   0xc   :  { %219 = vmatprep.subr.bf16.mxu0 %v476_v10  ;;  %457 = vmatprep.subr.bf16.mxu1 %v479_v11  ;;  %v132_v31 = vpack.c.bf16 %v51_v28, %v50_v27  ;;  %vm107_vm5 = vcmp.ge.s32.totalorder %v63_v57, 1 }
   0xd   :  { %v133_v32 = vpack.c.bf16 %v53_v30, %v52_v29  ;;  %vm591_vm6 = vcmp.lt.s32.totalorder %v84_v59, 15 }
   0xe   :  { %459 = vmatprep.mubr.msk.bf16.mxu1 %vm198_vm0, %v132_v31 }
   0xf   :  { %220 = vmatpush1.bf16.msra.mxu0 %v478_v17  ;;  %458 = vmatpush3.bf16.msra.mxu1 %v479_v11 }
  0x12   :  { %421 = vmatmul.mubr.msk.bf16.vlgmr.msra.gmra.mxu0 %vm198_vm0, %v132_v31  ;;  %460 = vmatmul.mubr.msk.bf16.vlgmr.msra.gmra.mxu1 %vm198_vm0, %v133_v32 }
  0x13   :  { %247 = vmatprep.mubr.bf16.mxu0 %v480_v1 }
  0x1a   :  { %422 = vmatmul.mubr.msk.bf16.gmra.mxu0 %vm198_vm0, %v133_v32 }
  0xd2   :  { %v239_v35 = vpop.f32.mrf.mxu0  ;;  %v461_v37 = vpop.f32.mrf.mxu1 }
  0xd3   :  { %v313_v45 = vrot.slane %v239_v35, 7  ;;  %v336_v54 = vrot.slane %v461_v37, 1 }
  0xd4   :  { %v241_v38 = vpop.f32.mrf.mxu0  ;;  %v292_v39 = vpop.f32.mrf.mxu1 }
  0xd5   :  { %v334_v60 = vrot.slane %v292_v39, 1 }
  0xd6   :  { %v243_v40 = vpop.f32.mrf.mxu0  ;;  %v462_v44 = vpop.f32.mrf.mxu1 }
  0xd7   :  { %v314_v43 = vrot.slane %v243_v40, 7  ;;  %v337_v61 = vrot.slane %v462_v44, 1 }
  0xd8   :  { %v245_v46 = vpop.f32.mrf.mxu0  ;;  %v295_v48 = vpop.f32.mrf.mxu1 }
  0xd9   :  { %v320_v50 = vsel %vm317_vm1, %v313_v45, %v314_v43  ;;  %v335_v55 = vrot.slane %v295_v48, 1  ;;  %v342_v10 = vsel %vm338_vm3, %v337_v61, %v334_v60  ;;  %v339_v19 = vsel %vm338_vm3, %v336_v54, %v337_v61 }
  0xda   :  { %v249_v52 = vpop.f32.mrf.mxu0  ;;  %v327_v62 = vadd.f32 %v425_v49, %v320_v50  ;;  %v346_v21 = vsel %vm591_vm6, %v342_v10, 0.0 }
  0xdb   :  { %v315_v56 = vrot.slane %v249_v52, 7  ;;  %v340_v3 = vsel %vm338_vm3, %v335_v55, %v336_v54  ;;  %v341_v22 = vsel %vm338_vm3, %v334_v60, %v335_v55 }
  0xdc   :  { %v251_v58 = vpop.f32.mrf.mxu0  ;;  %v331_v7 = vadd.f32 %v327_v62, %v245_v46  ;;  %v344_v11 = vsel %vm584_vm4, %v340_v3, 0.0 }
  0xdd   :  { %v319_v63 = vsel %vm317_vm1, %v314_v43, %v315_v56 }
  0xde   :  { %v324_v1 = vsel %vm579_vm2, %v319_v63, 0.0  ;;  %v253_v2 = vpop.f32.mrf.mxu0  ;;  %v348_v18 = vadd.f32 %v344_v11, %v331_v7 }
  0xdf   :  { %v328_v4 = vadd.f32 %v425_v49, %v324_v1  ;;  %v316_v5 = vrot.slane %v253_v2, 7 }
  0xe0   :  { %v255_v16 = vpop.f32.mrf.mxu0  ;;  %v382_v27 = vmul.f32 %v348_v18, %v348_v18 }
  0xe1   :  { %v321_v8 = vsel %vm317_vm1, %v316_v5, %v313_v45  ;;  %v318_v9 = vsel %vm317_vm1, %v315_v56, %v316_v5  ;;  %v332_v12 = vadd.f32 %v328_v4, %v251_v58 }
  0xe2   :  { %v322_v13 = vsel %vm107_vm5, %v321_v8, 0.0  ;;  %v329_v14 = vadd.f32 %v425_v49, %v318_v9 }
  0xe3   :  { %v326_v15 = vadd.f32 %v425_v49, %v322_v13  ;;  %v349_v23 = vadd.f32 %v339_v19, %v332_v12 }
  0xe4   :  { %v333_v17 = vadd.f32 %v329_v14, %v255_v16 }
  0xe5   :  { %v330_v20 = vadd.f32 %v326_v15, %v241_v38  ;;  %v383_v31 = vmul.f32 %v349_v23, %v349_v23 }
  0xe6   :  { %v350_v24 = vadd.f32 %v346_v21, %v333_v17 }
  0xe7   :  { %v347_v25 = vadd.f32 %v341_v22, %v330_v20 }
  0xe8   :  { %v442_v26 = vpack.c.bf16 %v350_v24, %v349_v23  ;;  %v384_v35 = vmul.f32 %v350_v24, %v350_v24 }
  0xe9   :  { %v437_v28 = vpack.c.bf16 %v348_v18, %v347_v25  ;;  %v371_v29 = vadd.f32 %v348_v18, %v347_v25  ;;  %v381_v30 = vmul.f32 %v347_v25, %v347_v25 }
  0xea   :  { %444 = vst [vmem:[%s621_s5 + $0x8] sm:$0xff] %v442_v26  }
  0xeb   :  { %438 = vst [vmem:[%s621_s5] sm:$0xff] %v437_v28   ;;  %v372_v32 = vadd.f32 %v371_v29, %v349_v23  ;;  %v385_v33 = vadd.f32 %v382_v27, %v381_v30 }
  0xed   :  { %v373_v34 = vadd.f32 %v372_v32, %v350_v24  ;;  %v386_v36 = vadd.f32 %v385_v33, %v383_v31 }
  0xef   :  { %v374_v37 = vrot.slane %v373_v34, 4  ;;  %v387_v38 = vadd.f32 %v386_v36, %v384_v35 }
  0xf1   :  { %v375_v39 = vadd.f32 %v374_v37, %v373_v34  ;;  %v388_v40 = vrot.slane %v387_v38, 4 }
  0xf3   :  { %v376_v41 = vrot.slane %v375_v39, 2  ;;  %v389_v42 = vadd.f32 %v388_v40, %v387_v38 }
  0xf5   :  { %v377_v43 = vadd.f32 %v376_v41, %v375_v39  ;;  %v390_v44 = vrot.slane %v389_v42, 2 }
  0xf7   :  { %v378_v45 = vrot.slane %v377_v43, 1  ;;  %v391_v46 = vadd.f32 %v390_v44, %v389_v42 }
  0xf9   :  { %v379_v47 = vadd.f32 %v378_v45, %v377_v43  ;;  %v392_v48 = vrot.slane %v391_v46, 1 }
  0xfb   :  { %380 = vst [vmem:[%s622_s6] sm:$0x1] %v379_v47  ;;  %v393_v49 = vadd.f32 %v392_v48, %v391_v46 }
  0xfd   :  { %394 = vst [vmem:[%s623_s7] sm:$0x1] %v393_v49 }

// kernel: double_conv2d_forward.3
= control target key start
LH: loop header
LB: loop body
LE: loop exit
PB: predicated region body
PF: predicated region fallthrough
CT: control target
= control target key end

     0   :  { %v864_v1 = vmov 0   ;;  %vm206_vm0 = vcmask 523264   ;;  %s1184_s6 = inlined_call_operand.vmem [shape: bf16[64,384], index: 6, kind: input, shape index: {}]   ;;  %s1185_s0 = inlined_call_operand.vmem [shape: f32[2,16,64], index: 0, kind: input, shape index: {}]   ;;  %s1186_s2 = inlined_call_operand.vmem [shape: f32[1,64], index: 2, kind: input, shape index: {}]   ;;  %s1187_s3 = inlined_call_operand.vmem [shape: f32[1,64], index: 3, kind: input, shape index: {}]   ;;  %s1188_s7 = inlined_call_operand.vmem [shape: bf16[128,384], index: 7, kind: input, shape index: {}]   ;;  %s1189_s1 = inlined_call_operand.vmem [shape: bf16[2,16,128], index: 1, kind: input, shape index: {}]   ;;  %s1190_s4 = inlined_call_operand.vmem [shape: f32[1,128], index: 4, kind: input, shape index: {}]   ;;  %s1191_s5 = inlined_call_operand.vmem [shape: f32[1,128], index: 5, kind: input, shape index: {}]   ;;  %s1192_s8 = inlined_call_operand.vmem [shape: f32[1,128], index: 8, kind: input, shape index: {}]   ;;  %s1193_s9 = inlined_call_operand.vmem [shape: f32[1,128], index: 9, kind: input, shape index: {}]   ;;  %s1194_s10 = inlined_call_operand.vmem [shape: f32[2,16,128], index: 10, kind: output, shape index: {}]  }
   0x1   :  { %v816_v0 = vld [vmem:[%s1184_s6 + $0x4c] ss:$12 sps:$4 sm:$0xff]   ;;  %245 = vmatprep.mubr.bf16.mxu0 %v864_v1  ;;  %v818_v2 = vld [vmem:[%s1184_s6 + $0x48] ss:$12 sps:$4 sm:$0xff]   ;;  %v819_v3 = vld [vmem:[%s1184_s6 + $0x50] ss:$12 sps:$4 sm:$0xff]  }
   0x2   :  { %221 = vmatprep.subr.bf16.mxu0 %v816_v0  ;;  %v820_v4 = vld [vmem:[%s1184_s6 + $0x34] ss:$12 sps:$4 sm:$0xff]   ;;  %v822_v5 = vld [vmem:[%s1184_s6 + $0x30] ss:$12 sps:$4 sm:$0xff]   ;;  %783 = vmatprep.subr.bf16.mxu1 %v819_v3  ;;  %v823_v6 = vld [vmem:[%s1184_s6 + $0x38] ss:$12 sps:$4 sm:$0xff]  }
   0x3   :  { %222 = vmatpush1.bf16.msra.mxu0 %v818_v2  ;;  %784 = vmatpush3.bf16.msra.mxu1 %v819_v3  ;;  %v824_v7 = vld [vmem:[%s1184_s6 + $0x1c] ss:$12 sps:$4 sm:$0xff]   ;;  %v827_v8 = vld [vmem:[%s1184_s6 + $0x20] ss:$12 sps:$4 sm:$0xff]   ;;  %v826_v9 = vld [vmem:[%s1184_s6 + $0x18] ss:$12 sps:$4 sm:$0xff]  }
   0x4   :  { %223 = vmatprep.subr.bf16.mxu0 %v820_v4  ;;  %785 = vmatprep.subr.bf16.mxu1 %v823_v6  ;;  %v828_v10 = vld [vmem:[%s1184_s6 + $0x4] ss:$12 sps:$4 sm:$0xff]   ;;  %v831_v11 = vld [vmem:[%s1184_s6 + $0x8] ss:$12 sps:$4 sm:$0xff]   ;;  %v712_v14 = vld [vmem:[%s1186_s2] ss:$0 sm:$0xff] }
   0x5   :  { %v97_v12 = vld [vmem:[%s1185_s0] sm:$0xff]  ;;  %v98_v13 = vld [vmem:[%s1185_s0 + $0x8] sm:$0xff]  ;;  %v99_v20 = vld [vmem:[%s1185_s0 + $0x10] sm:$0xff] }
   0x6   :  { %v713_v15 = vld [vmem:[%s1187_s3] ss:$0 sm:$0xff]  ;;  %v108_v17 = vmul.f32 %v712_v14, %v97_v12  ;;  %v109_v18 = vmul.f32 %v712_v14, %v98_v13  ;;  %v834_v19 = vld [vmem:[%s1188_s7 + $0xac] ss:$12 sps:$4 sm:$0xff]   ;;  %v110_v24 = vmul.f32 %v712_v14, %v99_v20  ;;  %v835_v26 = vld [vmem:[%s1188_s7 + $0xb0] ss:$12 sps:$4 sm:$0xff]  }
   0x7   :  { %224 = vmatpush1.bf16.msra.mxu0 %v822_v5  ;;  %786 = vmatpush3.bf16.msra.mxu1 %v823_v6  ;;  %v830_v16 = vld [vmem:[%s1184_s6] ss:$12 sps:$4 sm:$0xff]   ;;  %v100_v21 = vld [vmem:[%s1185_s0 + $0x18] sm:$0xff]  ;;  %v832_v28 = vld [vmem:[%s1188_s7 + $0xa8] ss:$12 sps:$4 sm:$0xff]  }
   0x8   :  { %225 = vmatprep.subr.bf16.mxu0 %v824_v7  ;;  %787 = vmatprep.subr.bf16.mxu1 %v827_v8  ;;  %v119_v22 = vadd.f32 %v713_v15, %v108_v17  ;;  %v120_v23 = vadd.f32 %v713_v15, %v109_v18  ;;  %v111_v25 = vmul.f32 %v712_v14, %v100_v21  ;;  %v838_v31 = vld [vmem:[%s1188_s7 + $0x94] ss:$12 sps:$4 sm:$0xff]   ;;  %v839_v33 = vld [vmem:[%s1188_s7 + $0x98] ss:$12 sps:$4 sm:$0xff]   ;;  %v836_v34 = vld [vmem:[%s1188_s7 + $0x90] ss:$12 sps:$4 sm:$0xff]  }
   0x9   :  { %v121_v29 = vadd.f32 %v713_v15, %v110_v24  ;;  %v842_v35 = vld [vmem:[%s1188_s7 + $0x7c] ss:$12 sps:$4 sm:$0xff]   ;;  %v843_v36 = vld [vmem:[%s1188_s7 + $0x80] ss:$12 sps:$4 sm:$0xff]   ;;  %v840_v37 = vld [vmem:[%s1188_s7 + $0x78] ss:$12 sps:$4 sm:$0xff]  }
   0xa   :  { %v140_v27 = vpack.c.bf16 %v120_v23, %v119_v22  ;;  %v122_v30 = vadd.f32 %v713_v15, %v111_v25  ;;  %v846_v38 = vld [vmem:[%s1188_s7 + $0x64] ss:$12 sps:$4 sm:$0xff]   ;;  %v847_v39 = vld [vmem:[%s1188_s7 + $0x68] ss:$12 sps:$4 sm:$0xff]   ;;  %v844_v40 = vld [vmem:[%s1188_s7 + $0x60] ss:$12 sps:$4 sm:$0xff]   ;;  %v36_v15 = vlaneseq }
   0xb   :  { %226 = vmatpush1.bf16.msra.mxu0 %v826_v9  ;;  %788 = vmatpush3.bf16.msra.mxu1 %v827_v8  ;;  %v850_v41 = vld [vmem:[%s1188_s7 + $0x4c] ss:$12 sps:$4 sm:$0xff]   ;;  %v851_v42 = vld [vmem:[%s1188_s7 + $0x50] ss:$12 sps:$4 sm:$0xff]   ;;  %v759_v43 = vld [vmem:[%s1189_s1] sm:$0xff]  }
   0xc   :  { %227 = vmatprep.subr.bf16.mxu0 %v828_v10  ;;  %789 = vmatprep.subr.bf16.mxu1 %v831_v11  ;;  %v141_v32 = vpack.c.bf16 %v122_v30, %v121_v29  ;;  %v731_v44 = vld [vmem:[%s1190_s4] ss:$0 sm:$0xff]  ;;  %v848_v45 = vld [vmem:[%s1188_s7 + $0x48] ss:$12 sps:$4 sm:$0xff]   ;;  %v760_v46 = vunpack.c.l.bf16 %v759_v43  ;;  %v761_v47 = vunpack.c.h.bf16 %v759_v43  ;;  %v855_v55 = vld [vmem:[%s1188_s7 + $0x38] ss:$12 sps:$4 sm:$0xff]  }
   0xd   :  { %791 = vmatprep.mubr.msk.bf16.mxu1 %vm206_vm0, %v140_v27  ;;  %v766_v48 = vld [vmem:[%s1189_s1 + $0x8] sm:$0xff]   ;;  %v854_v49 = vld [vmem:[%s1188_s7 + $0x34] ss:$12 sps:$4 sm:$0xff]   ;;  %v852_v56 = vld [vmem:[%s1188_s7 + $0x30] ss:$12 sps:$4 sm:$0xff]   ;;  %v1070_v18 = vshrl.u32 %v36_v15, 7 }
   0xe   :  { %v732_v50 = vld [vmem:[%s1191_s5] ss:$0 sm:$0xff]  ;;  %v764_v51 = vunpack.c.l.bf16 %v766_v48  ;;  %v765_v52 = vunpack.c.h.bf16 %v766_v48  ;;  %v374_v53 = vmul.f32 %v760_v46, %v731_v44  ;;  %v375_v54 = vmul.f32 %v761_v47, %v731_v44  ;;  %v858_v59 = vld [vmem:[%s1188_s7 + $0x1c] ss:$12 sps:$4 sm:$0xff]   ;;  %v856_v2 = vld [vmem:[%s1188_s7 + $0x18] ss:$12 sps:$4 sm:$0xff]  }
   0xf   :  { %228 = vmatpush1.bf16.msra.mxu0 %v830_v16  ;;  %790 = vmatpush3.bf16.msra.mxu1 %v831_v11  ;;  %v859_v0 = vld [vmem:[%s1188_s7 + $0x20] ss:$12 sps:$4 sm:$0xff]   ;;  %v862_v4 = vld [vmem:[%s1188_s7 + $0x4] ss:$12 sps:$4 sm:$0xff]   ;;  %v863_v7 = vld [vmem:[%s1188_s7 + $0x8] ss:$12 sps:$4 sm:$0xff]  }
  0x10   :  { %556 = vmatprep.subr.bf16.mxu0 %v834_v19  ;;  %795 = vmatprep.subr.bf16.mxu1 %v835_v26  ;;  %v385_v57 = vadd.f32 %v732_v50, %v374_v53  ;;  %v386_v58 = vadd.f32 %v732_v50, %v375_v54  ;;  %v376_v60 = vmul.f32 %v764_v51, %v731_v44  ;;  %v860_v8 = vld [vmem:[%s1188_s7] ss:$12 sps:$4 sm:$0xff]   ;;  %v39_v21 = vadd.s32 16, %v1070_v18 }
  0x11   :  { %v377_v61 = vmul.f32 %v765_v52, %v731_v44  ;;  %vm325_vm1 = vcmp.lt.s32.totalorder %v1070_v18, 1  ;;  %v38_v24 = vadd.s32 8, %v1070_v18  ;;  %vm346_vm3 = vcmp.lt.s32.totalorder %v1070_v18, 7  ;;  %v757_v52 = vld [vmem:[%s1193_s9] ss:$0 sm:$0xff] }
  0x12   :  { %726 = vmatmul.mubr.msk.bf16.vlgmr.msra.gmra.mxu0 %vm206_vm0, %v140_v27  ;;  %792 = vmatmul.mubr.msk.bf16.vlgmr.msra.gmra.mxu1 %vm206_vm0, %v141_v32  ;;  %v389_v62 = vmax.f32 %v385_v57, 0.0  ;;  %v390_v63 = vmax.f32 %v386_v58, 0.0  ;;  %v387_v5 = vadd.f32 %v732_v50, %v376_v60 }
  0x13   :  { %557 = vmatpush1.bf16.msra.mxu0 %v832_v28  ;;  %255 = vmatprep.mubr.bf16.mxu0 %v864_v1  ;;  %v388_v6 = vadd.f32 %v732_v50, %v377_v61 }
  0x14   :  { %558 = vmatprep.subr.bf16.mxu0 %v838_v31  ;;  %796 = vmatpush3.bf16.msra.mxu1 %v835_v26  ;;  %v426_v3 = vpack.c.bf16 %v390_v63, %v389_v62  ;;  %v391_v9 = vmax.f32 %v387_v5, 0.0  ;;  %v59_v26 = vand.u32 15, %v39_v21  ;;  %v730_v31 = vld [vmem:[%s1192_s8] ss:$0 sm:$0xff] }
  0x15   :  { %797 = vmatprep.subr.bf16.mxu1 %v839_v33  ;;  %v392_v10 = vmax.f32 %v388_v6, 0.0 }
  0x16   :  { %811 = vmatprep.mubr.bf16.mxu1 %v426_v3  ;;  %vm1086_vm2 = vcmp.ge.s32.totalorder %v59_v26, 1 }
  0x17   :  { %559 = vmatpush1.bf16.msra.mxu0 %v836_v34  ;;  %v427_v11 = vpack.c.bf16 %v392_v10, %v391_v9 }
  0x18   :  { %560 = vmatprep.subr.bf16.mxu0 %v842_v35  ;;  %798 = vmatpush3.bf16.msra.mxu1 %v839_v33  ;;  %v52_v33 = vand.u32 15, %v38_v24 }
  0x19   :  { %799 = vmatprep.subr.bf16.mxu1 %v843_v36 }
  0x1a   :  { %727 = vmatmul.mubr.msk.bf16.gmra.mxu0 %vm206_vm0, %v141_v32  ;;  %vm1102_vm4 = vcmp.lt.s32.totalorder %v52_v33, 15 }
  0x1b   :  { %561 = vmatpush1.bf16.msra.mxu0 %v840_v37  ;;  %588 = vmatprep.mubr.bf16.mxu0 %v864_v1 }
  0x1c   :  { %562 = vmatprep.subr.bf16.mxu0 %v846_v38  ;;  %800 = vmatpush3.bf16.msra.mxu1 %v843_v36 }
  0x1d   :  { %801 = vmatprep.subr.bf16.mxu1 %v847_v39 }
  0x1f   :  { %563 = vmatpush1.bf16.msra.mxu0 %v844_v40  ;;  %v45_v40 = vand.u32 15, %v1070_v18 }
  0x20   :  { %564 = vmatprep.subr.bf16.mxu0 %v850_v41  ;;  %802 = vmatpush3.bf16.msra.mxu1 %v847_v39 }
  0x21   :  { %803 = vmatprep.subr.bf16.mxu1 %v851_v42  ;;  %vm1117_vm5 = vcmp.ge.s32.totalorder %v45_v40, 1 }
  0x23   :  { %565 = vmatpush1.bf16.msra.mxu0 %v848_v45 }
  0x24   :  { %566 = vmatprep.subr.bf16.mxu0 %v854_v49  ;;  %804 = vmatpush3.bf16.msra.mxu1 %v851_v42  ;;  %v40_v49 = vadd.s32 24, %v1070_v18 }
  0x25   :  { %805 = vmatprep.subr.bf16.mxu1 %v855_v55 }
  0x27   :  { %567 = vmatpush1.bf16.msra.mxu0 %v852_v56 }
  0x28   :  { %568 = vmatprep.subr.bf16.mxu0 %v858_v59  ;;  %806 = vmatpush3.bf16.msra.mxu1 %v855_v55 }
  0x29   :  { %807 = vmatprep.subr.bf16.mxu1 %v859_v0 }
  0x2b   :  { %569 = vmatpush1.bf16.msra.mxu0 %v856_v2 }
  0x2c   :  { %570 = vmatprep.subr.bf16.mxu0 %v862_v4  ;;  %808 = vmatpush3.bf16.msra.mxu1 %v859_v0  ;;  %v66_v4 = vand.u32 15, %v40_v49 }
  0x2d   :  { %809 = vmatprep.subr.bf16.mxu1 %v863_v7 }
  0x2e   :  { %vm1144_vm6 = vcmp.lt.s32.totalorder %v66_v4, 15 }
  0x2f   :  { %571 = vmatpush1.bf16.msra.mxu0 %v860_v8 }
  0x30   :  { %810 = vmatpush3.bf16.msra.mxu1 %v863_v7 }
  0x32   :  { %589 = vmatmul.mubr.bf16.vlgmr.msra.gmra.mxu0 %v426_v3 }
  0x33   :  { %598 = vmatprep.mubr.bf16.mxu0 %v864_v1  ;;  %812 = vmatmul.mubr.bf16.vlgmr.msra.gmra.mxu1 %v427_v11 }
  0x3a   :  { %599 = vmatmul.mubr.bf16.gmra.mxu0 %v427_v11 }
  0xd2   :  { %v247_v12 = vpop.f32.mrf.mxu0  ;;  %v1068_v17 = vpop.f32.mrf.mxu1 }
  0xd3   :  { %v321_v28 = vrot.slane %v247_v12, 7  ;;  %v344_v37 = vrot.slane %v1068_v17, 1 }
  0xd4   :  { %v1066_v13 = vpop.f32.mrf.mxu0  ;;  %v1072_v20 = vpop.f32.mrf.mxu1 }
  0xd5   :  { %v342_v3 = vrot.slane %v1072_v20, 1 }
  0xd6   :  { %v251_v14 = vpop.f32.mrf.mxu0  ;;  %v1075_v23 = vpop.f32.mrf.mxu1 }
  0xd7   :  { %v322_v1 = vrot.slane %v251_v14, 7  ;;  %v345_v7 = vrot.slane %v1075_v23, 1 }
  0xd8   :  { %v253_v16 = vpop.f32.mrf.mxu0  ;;  %v1079_v29 = vpop.f32.mrf.mxu1 }
  0xd9   :  { %v328_v32 = vsel %vm325_vm1, %v321_v28, %v322_v1  ;;  %v343_v38 = vrot.slane %v1079_v29, 1  ;;  %v347_v26 = vsel %vm346_vm3, %v344_v37, %v345_v7 }
  0xda   :  { %v257_v19 = vpop.f32.mrf.mxu0  ;;  %v335_v39 = vadd.f32 %v730_v31, %v328_v32  ;;  %v350_v32 = vsel %vm346_vm3, %v345_v7, %v342_v3 }
  0xdb   :  { %v323_v25 = vrot.slane %v257_v19, 7  ;;  %v348_v48 = vsel %vm346_vm3, %v343_v38, %v344_v37 }
  0xdc   :  { %v259_v22 = vpop.f32.mrf.mxu0  ;;  %v339_v53 = vadd.f32 %v335_v39, %v253_v16  ;;  %v352_v62 = vsel %vm1102_vm4, %v348_v48, 0.0 }
  0xdd   :  { %v327_v35 = vsel %vm325_vm1, %v322_v1, %v323_v25 }
  0xde   :  { %v261_v27 = vpop.f32.mrf.mxu0  ;;  %v332_v43 = vsel %vm1086_vm2, %v327_v35, 0.0  ;;  %v356_v12 = vadd.f32 %v352_v62, %v339_v53 }
  0xdf   :  { %v324_v44 = vrot.slane %v261_v27, 7  ;;  %v336_v54 = vadd.f32 %v730_v31, %v332_v43 }
  0xe0   :  { %v263_v30 = vpop.f32.mrf.mxu0 }
  0xe1   :  { %v329_v58 = vsel %vm325_vm1, %v324_v44, %v321_v28  ;;  %v326_v59 = vsel %vm325_vm1, %v323_v25, %v324_v44  ;;  %v340_v14 = vadd.f32 %v336_v54, %v259_v22 }
  0xe2   :  { %v330_v8 = vsel %vm1117_vm5, %v329_v58, 0.0  ;;  %v337_v9 = vadd.f32 %v730_v31, %v326_v59 }
  0xe3   :  { %v334_v1 = vadd.f32 %v730_v31, %v330_v8  ;;  %v357_v40 = vadd.f32 %v347_v26, %v340_v14 }
  0xe4   :  { %v341_v28 = vadd.f32 %v337_v9, %v263_v30 }
  0xf2   :  { %v1092_v36 = vpop.f32.mrf.mxu0 }
  0xf3   :  { %v813_v41 = vpop.f32.mrf.mxu1  ;;  %v664_v50 = vrot.slane %v1092_v36, 7 }
  0xf4   :  { %v1098_v42 = vpop.f32.mrf.mxu0  ;;  %v686_v60 = vrot.slane %v813_v41, 1  ;;  %v338_v41 = vadd.f32 %v334_v1, %v1066_v13  ;;  %v349_v13 = vsel %vm346_vm3, %v342_v3, %v343_v38 }
  0xf5   :  { %v1106_v46 = vpop.f32.mrf.mxu1 }
  0xf6   :  { %v594_v47 = vpop.f32.mrf.mxu0  ;;  %v684_v17 = vrot.slane %v1106_v46, 1  ;;  %v355_v54 = vadd.f32 %v349_v13, %v338_v41 }
  0xf7   :  { %v665_v51 = vrot.slane %v594_v47, 7  ;;  %v814_v56 = vpop.f32.mrf.mxu1  ;;  %v354_v47 = vsel %vm1144_vm6, %v350_v32, 0.0 }
  0xf8   :  { %v596_v57 = vpop.f32.mrf.mxu0  ;;  %v687_v19 = vrot.slane %v814_v56, 1 }
  0xf9   :  { %v670_v61 = vsel %vm325_vm1, %v664_v50, %v665_v51  ;;  %v646_v0 = vpop.f32.mrf.mxu1 }
  0xfa   :  { %v677_v63 = vadd.f32 %v757_v52, %v670_v61  ;;  %v600_v2 = vpop.f32.mrf.mxu0  ;;  %v685_v5 = vrot.slane %v646_v0, 1  ;;  %v688_v36 = vsel %vm346_vm3, %v686_v60, %v687_v19  ;;  %v691_v30 = vsel %vm346_vm3, %v687_v19, %v684_v17 }
  0xfb   :  { %v666_v6 = vrot.slane %v600_v2, 7 }
  0xfc   :  { %v681_v10 = vadd.f32 %v677_v63, %v596_v57  ;;  %v602_v11 = vpop.f32.mrf.mxu0  ;;  %v689_v15 = vsel %vm346_vm3, %v685_v5, %v686_v60 }
  0xfd   :  { %v669_v16 = vsel %vm325_vm1, %v665_v51, %v666_v6  ;;  %v693_v20 = vsel %vm1102_vm4, %v689_v15, 0.0  ;;  %v358_v51 = vadd.f32 %v354_v47, %v341_v28 }
  0xfe   :  { %v674_v21 = vsel %vm1086_vm2, %v669_v16, 0.0  ;;  %v604_v23 = vpop.f32.mrf.mxu0  ;;  %v697_v24 = vadd.f32 %v693_v20, %v681_v10 }
  0xff   :  { %v678_v25 = vadd.f32 %v757_v52, %v674_v21  ;;  %v667_v22 = vrot.slane %v604_v23, 7 }
 0x100   :  { %v701_v33 = vadd.f32 %v697_v24, %v356_v12  ;;  %v606_v45 = vpop.f32.mrf.mxu0 }
 0x101   :  { %v682_v35 = vadd.f32 %v678_v25, %v602_v11  ;;  %v671_v34 = vsel %vm325_vm1, %v667_v22, %v664_v50  ;;  %v668_v31 = vsel %vm325_vm1, %v666_v6, %v667_v22  ;;  %v695_v50 = vsel %vm1144_vm6, %v691_v30, 0.0 }
 0x102   :  { %v672_v37 = vsel %vm1117_vm5, %v671_v34, 0.0  ;;  %v679_v39 = vadd.f32 %v757_v52, %v668_v31  ;;  %705 = vst [vmem:[%s1194_s10 + $0x8] sm:$0xff] %v701_v33 }
 0x103   :  { %v698_v43 = vadd.f32 %v688_v36, %v682_v35  ;;  %v676_v44 = vadd.f32 %v757_v52, %v672_v37  ;;  %v690_v52 = vsel %vm346_vm3, %v684_v17, %v685_v5 }
 0x104   :  { %v683_v46 = vadd.f32 %v679_v39, %v606_v45 }
 0x105   :  { %v702_v48 = vadd.f32 %v698_v43, %v357_v40  ;;  %v680_v49 = vadd.f32 %v676_v44, %v1098_v42 }
 0x106   :  { %v699_v53 = vadd.f32 %v695_v50, %v683_v46 }
 0x107   :  { %706 = vst [vmem:[%s1194_s10 + $0x10] sm:$0xff] %v702_v48  ;;  %v696_v55 = vadd.f32 %v690_v52, %v680_v49 }
 0x108   :  { %v703_v42 = vadd.f32 %v699_v53, %v358_v51 }
 0x109   :  { %v700_v56 = vadd.f32 %v696_v55, %v355_v54 }
 0x10a   :  { %707 = vst [vmem:[%s1194_s10 + $0x18] sm:$0xff] %v703_v42 }
 0x10b   :  { %704 = vst [vmem:[%s1194_s10] sm:$0xff] %v700_v56 }

</bundles_post_ra>
